<compile_context>
chip_gen: v7x
topology: tpu7x:2x2x1
jax: 0.10.0
libtpu: 0.0.40
codegen_flags: <defaults>
</compile_context>

<pallas_src>
import functools

import numpy as np
import jax
import jax.numpy as jnp
from jax import lax
from jax.experimental import pallas as pl
from jax.experimental.pallas import tpu as pltpu

_BIG_NEG = 1e30


def _round_up(v, m):
    return ((v + m - 1) // m) * m


def _gcn_fused_kernel(x_ref, adj_ref, w_ref, b_ref, o_ref, *,
                      num_layers, negative_slope, src_col, dst_col, ones_col):
    """All GATConv layers of GCN_v1 in one kernel; activations stay in VMEM."""
    n_pad, f_pad = o_ref.shape

    # Additive mask bias built once from the int8 adjacency:
    # adj==1 -> 0.0, adj==0 -> -1e30.  Pure convert + mul/sub, no selects.
    mask_bias = (adj_ref[...].astype(jnp.float32) - 1.0) * jnp.float32(_BIG_NEG)

    col_ids = lax.broadcasted_iota(jnp.int32, (n_pad, f_pad), 1)

    x = x_ref[...]                                        # (Np, Fp) f32
    for layer in range(num_layers):                       # static unroll
        w = w_ref[layer]                                  # (Fp, Fp) bf16
        bias = b_ref[layer, :, :]                         # (1, Fp) f32

        # Projection on the MXU (bf16 in, f32 accumulate).  a_src / a_dst were
        # folded into two padded columns of W, so the attention logits come
        # out of the same matmul for free.
        h = jnp.dot(x.astype(jnp.bfloat16), w,
                    preferred_element_type=jnp.float32)   # (Np, Fp)

        s_src = h[:, src_col:src_col + 1]                 # (Np, 1) = <h, a_src>
        s_dst = h[:, dst_col:dst_col + 1]                 # (Np, 1) = <h, a_dst>

        # e[i, j] = LeakyReLU(s_dst_i + s_src_j) + additive mask.
        e = s_dst + jnp.transpose(s_src)                  # (Np, Np)
        e = jnp.maximum(e, negative_slope * e)            # LeakyReLU (mul+max)
        e = e + mask_bias

        # Softmax numerator; masked entries underflow to exactly 0.
        p = jnp.exp(e - jnp.max(e, axis=-1, keepdims=True))   # (Np, Np)

        # Plant a ones column in a padded slot of h so the aggregate matmul
        # also yields the softmax row-sum (no extra (N,N) XLU reduction).
        h_agg = jnp.where(col_ids == ones_col, 1.0, h).astype(jnp.bfloat16)

        agg = jnp.dot(p.astype(jnp.bfloat16), h_agg,
                      preferred_element_type=jnp.float32)     # (Np, Fp)
        row_sum = agg[:, ones_col:ones_col + 1]               # (Np, 1)

        # Normalize AFTER the matmul: (Np,1) EUP reciprocal + (Np,Fp) multiply.
        out = agg * pl.reciprocal(row_sum, approx=True) + bias
        if layer < num_layers - 1:                        # hidden layers: ReLU
            out = jnp.maximum(out, 0.0)
        x = out

    o_ref[...] = x                                        # lane-dense full store


def make_gcn_forward(adj, params, *, negative_slope=0.2):
    """Build a jitted forward for a fixed graph/params (GCN_v1.forward)."""
    num_layers = len(params)
    f_in = int(params[0]["w"].shape[0])
    f_out_last = int(params[-1]["w"].shape[1])
    n = int(adj.shape[0])

    feat_dims = [f_in] + [int(p["w"].shape[1]) for p in params]
    # +3 padded feature slots: <h,a_src>, <h,a_dst>, softmax row-sum column.
    f_pad = _round_up(max(feat_dims) + 3, 128)
    n_pad = _round_up(max(n, 8), 128)
    src_col, dst_col, ones_col = f_pad - 3, f_pad - 2, f_pad - 1

    # ---- one-time host-side constant packing (numpy; no device scatters) ----
    w_np = np.zeros((num_layers, f_pad, f_pad), np.float32)
    b_np = np.zeros((num_layers, 1, f_pad), np.float32)
    for li, p in enumerate(params):
        W = np.asarray(p["w"], np.float32)                 # (fi, fo)
        a_src = np.asarray(p["a_src"], np.float32).reshape(-1)
        a_dst = np.asarray(p["a_dst"], np.float32).reshape(-1)
        fi, fo = W.shape
        w_np[li, :fi, :fo] = W
        w_np[li, :fi, src_col] = W @ a_src                 # folded logit columns
        w_np[li, :fi, dst_col] = W @ a_dst
        b_np[li, 0, :fo] = np.asarray(p["bias"], np.float32).reshape(-1)

    adj_np = np.zeros((n_pad, n_pad), np.int8)
    adj_np[:n, :n] = (np.asarray(adj) > 0)
    np.fill_diagonal(adj_np, 1)      # self-loops (GATConv default), incl. padded

    adj_i8 = jnp.asarray(adj_np)                 # int8: 4x less DMA than f32 mask
    w_p = jnp.asarray(w_np, jnp.bfloat16)        # native MXU dtype
    b_p = jnp.asarray(b_np)

    kernel = functools.partial(
        _gcn_fused_kernel, num_layers=num_layers, negative_slope=negative_slope,
        src_col=src_col, dst_col=dst_col, ones_col=ones_col)

    flops = num_layers * (2 * n_pad * f_pad * f_pad + 2 * n_pad * n_pad * f_pad)
    transcendentals = num_layers * (n_pad * n_pad + n_pad)
    bytes_accessed = (4 * n_pad * f_pad                        # x in
                      + n_pad * n_pad                          # int8 adjacency
                      + num_layers * (2 * f_pad * f_pad + 4 * f_pad)  # w + bias
                      + 4 * n_pad * f_pad)                     # out

    pcall = pl.pallas_call(
        kernel,
        out_shape=jax.ShapeDtypeStruct((n_pad, f_pad), jnp.float32),
        in_specs=[pl.BlockSpec(memory_space=pltpu.MemorySpace.VMEM)] * 4,
        out_specs=pl.BlockSpec(memory_space=pltpu.MemorySpace.VMEM),
        cost_estimate=pl.CostEstimate(
            flops=flops, transcendentals=transcendentals,
            bytes_accessed=bytes_accessed),
    )

    @jax.jit
    def forward(x):
        x_p = jnp.pad(x.astype(jnp.float32),
                      ((0, n_pad - n), (0, f_pad - f_in)))
        out_p = pcall(x_p, adj_i8, w_p, b_p)
        return out_p[:n, :f_out_last]

    return forward


def init_gat_params(key, sizes):
    """Glorot-style init matching GATConv parameter shapes.

    Note: w is stored (Fin, Fout), i.e. transposed relative to PyG's
    lin.weight (Fout, Fin) -- transpose when loading real checkpoints.
    """
    params = []
    for i in range(len(sizes) - 1):
        fin, fout = sizes[i], sizes[i + 1]
        key, k_w, k_s, k_d = jax.random.split(key, 4)
        scale_w = jnp.sqrt(6.0 / (fin + fout))
        scale_a = jnp.sqrt(6.0 / (fout + 1))
        params.append(dict(
            w=jax.random.uniform(k_w, (fin, fout), jnp.float32, -scale_w, scale_w),
            a_src=jax.random.uniform(k_s, (1, fout), jnp.float32, -scale_a, scale_a),
            a_dst=jax.random.uniform(k_d, (1, fout), jnp.float32, -scale_a, scale_a),
            bias=jnp.zeros((1, fout), jnp.float32),
        ))
    return params


def build_adjacency(edge_index, num_nodes):
    """adj[i, j] = 1 iff edge j -> i exists (numpy, int8).

    The dense-mask formulation collapses duplicate (src, dst) pairs, whereas
    PyG softmaxes each edge instance separately -> edges must be unique.
    """
    ei = np.asarray(edge_index)
    assert np.unique(ei.T, axis=0).shape[0] == ei.shape[1], \
        "build_adjacency requires unique edges"
    adj = np.zeros((num_nodes, num_nodes), np.int8)
    adj[ei[1], ei[0]] = 1
    return adj


if __name__ == "__main__":
    key = jax.random.PRNGKey(0)

    # Small synthetic graph consistent with GCN_v1(sizes=[8, 32, 16]).
    num_nodes = 16
    num_edges = 40
    sizes = [8, 32, 16]

    key, k_x, k_src, k_dst, k_ef, k_p = jax.random.split(key, 6)
    x = jax.random.normal(k_x, (num_nodes, sizes[0]), jnp.float32)
    src = np.asarray(jax.random.randint(k_src, (num_edges,), 0, num_nodes))
    dst = np.asarray(jax.random.randint(k_dst, (num_edges,), 0, num_nodes))
    # Deduplicate edges so the dense-mask formulation matches PyG exactly.
    pairs = np.unique(np.stack([src, dst], axis=1), axis=0)
    edge_index = pairs.T                                    # (2, E)

    # edge_features are accepted by GCN_v1.forward but GATConv(edge_dim=None)
    # ignores them, so they play no role in the computation.
    edge_features = jax.random.normal(
        k_ef, (edge_index.shape[1], 4), jnp.float32)
    # TODO(synk): if edge_dim were set on GATConv, edge_features would feed an
    # extra per-edge attention term; not modeled since the reference ignores them.

    adj = build_adjacency(edge_index, num_nodes)
    params = init_gat_params(k_p, sizes)

    forward = make_gcn_forward(adj, params)
    out = jax.block_until_ready(forward(x))
    assert out.shape == (num_nodes, sizes[-1])
    assert bool(jnp.all(jnp.isfinite(out)))
    print("KERNEL_OK")
</pallas_src>

<mosaic_0001>
module attributes {stable_mosaic.version = 11 : i64} {
  func.func @_gcn_fused_kernel(%arg0: memref<128x128xf32, #tpu.memory_space<vmem>>, %arg1: memref<128x128xi8, #tpu.memory_space<vmem>>, %arg2: memref<2x128x128xbf16, #tpu.memory_space<vmem>>, %arg3: memref<2x1x128xf32, #tpu.memory_space<vmem>>, %arg4: memref<128x128xf32, #tpu.memory_space<vmem>>) attributes {dimension_semantics = [], scalar_prefetch = 0 : i64, scratch_operands = 0 : i64, tpu.core_type = #tpu.core_type<tc>} {
    %c0 = arith.constant 0 : index
    %c0_0 = arith.constant 0 : index
    %0 = vector.load %arg1[%c0, %c0_0] : memref<128x128xi8, #tpu.memory_space<vmem>>, vector<128x128xi8>
    %1 = arith.sitofp %0 : vector<128x128xi8> to vector<128x128xf32>
    %cst = arith.constant 1.000000e+00 : f32
    %2 = vector.broadcast %cst : f32 to vector<128x128xf32>
    %3 = arith.subf %1, %2 : vector<128x128xf32>
    %cst_1 = arith.constant 1.000000e+30 : f32
    %4 = vector.broadcast %cst_1 : f32 to vector<128x128xf32>
    %5 = arith.mulf %3, %4 : vector<128x128xf32>
    %6 = tpu.iota {dimensions = array<i32: 1>} : vector<128x128xi32>
    %c0_2 = arith.constant 0 : index
    %c0_3 = arith.constant 0 : index
    %7 = vector.load %arg0[%c0_2, %c0_3] : memref<128x128xf32, #tpu.memory_space<vmem>>, vector<128x128xf32>
    %c0_4 = arith.constant 0 : index
    %c0_5 = arith.constant 0 : index
    %c0_6 = arith.constant 0 : index
    %8 = vector.load %arg2[%c0_4, %c0_5, %c0_6] : memref<2x128x128xbf16, #tpu.memory_space<vmem>>, vector<1x128x128xbf16>
    %9 = vector.shape_cast %8 : vector<1x128x128xbf16> to vector<128x128xbf16>
    %c0_7 = arith.constant 0 : index
    %c0_8 = arith.constant 0 : index
    %c0_9 = arith.constant 0 : index
    %10 = vector.load %arg3[%c0_7, %c0_8, %c0_9] : memref<2x1x128xf32, #tpu.memory_space<vmem>>, vector<1x1x128xf32>
    %11 = vector.shape_cast %10 : vector<1x1x128xf32> to vector<1x128xf32>
    %12 = arith.truncf %7 : vector<128x128xf32> to vector<128x128xbf16>
    %cst_10 = arith.constant dense<0.000000e+00> : vector<128x128xf32>
    %13 = tpu.matmul %12, %9, %cst_10 {dimension_numbers = #tpu.dot_dimension_numbers<[1], [0], [0], [1], [0, 0, 1, 1], [], []>} : vector<128x128xbf16>, vector<128x128xbf16>, vector<128x128xf32> -> vector<128x128xf32>
    %14 = vector.extract_strided_slice %13 {offsets = [0, 125], sizes = [128, 1], strides = [1, 1]} : vector<128x128xf32> to vector<128x1xf32>
    %15 = vector.extract_strided_slice %13 {offsets = [0, 126], sizes = [128, 1], strides = [1, 1]} : vector<128x128xf32> to vector<128x1xf32>
    %16 = tpu.transpose %14, [1, 0] : vector<128x1xf32> -> vector<1x128xf32>
    %17 = vector.broadcast %15 : vector<128x1xf32> to vector<128x128xf32>
    %18 = vector.broadcast %16 : vector<1x128xf32> to vector<128x128xf32>
    %19 = arith.addf %17, %18 : vector<128x128xf32>
    %cst_11 = arith.constant 2.000000e-01 : f32
    %20 = vector.broadcast %cst_11 : f32 to vector<128x128xf32>
    %21 = arith.mulf %20, %19 : vector<128x128xf32>
    %22 = arith.maximumf %19, %21 : vector<128x128xf32>
    %23 = arith.addf %22, %5 : vector<128x128xf32>
    %cst_12 = arith.constant dense<0xFF800000> : vector<128xf32>
    %24 = vector.multi_reduction <maximumf>, %23, %cst_12 [1] : vector<128x128xf32> to vector<128xf32>
    %25 = vector.shape_cast %24 : vector<128xf32> to vector<128x1xf32>
    %26 = vector.broadcast %25 : vector<128x1xf32> to vector<128x128xf32>
    %27 = arith.subf %23, %26 : vector<128x128xf32>
    %28 = math.exp %27 : vector<128x128xf32>
    %c127_i32 = arith.constant 127 : i32
    %29 = vector.broadcast %c127_i32 : i32 to vector<128x128xi32>
    %30 = arith.cmpi eq, %6, %29 : vector<128x128xi32>
    %cst_13 = arith.constant 1.000000e+00 : f32
    %31 = vector.broadcast %cst_13 : f32 to vector<128x128xf32>
    %32 = arith.select %30, %31, %13 : vector<128x128xi1>, vector<128x128xf32>
    %33 = arith.truncf %32 : vector<128x128xf32> to vector<128x128xbf16>
    %34 = arith.truncf %28 : vector<128x128xf32> to vector<128x128xbf16>
    %cst_14 = arith.constant dense<0.000000e+00> : vector<128x128xf32>
    %35 = tpu.matmul %34, %33, %cst_14 {dimension_numbers = #tpu.dot_dimension_numbers<[1], [0], [0], [1], [0, 0, 1, 1], [], []>} : vector<128x128xbf16>, vector<128x128xbf16>, vector<128x128xf32> -> vector<128x128xf32>
    %36 = vector.extract_strided_slice %35 {offsets = [0, 127], sizes = [128, 1], strides = [1, 1]} : vector<128x128xf32> to vector<128x1xf32>
    %37 = tpu.reciprocal %36 {approx = true} : vector<128x1xf32> -> vector<128x1xf32>
    %38 = vector.broadcast %37 : vector<128x1xf32> to vector<128x128xf32>
    %39 = arith.mulf %35, %38 : vector<128x128xf32>
    %40 = vector.broadcast %11 : vector<1x128xf32> to vector<128x128xf32>
    %41 = arith.addf %39, %40 : vector<128x128xf32>
    %cst_15 = arith.constant 0.000000e+00 : f32
    %42 = vector.broadcast %cst_15 : f32 to vector<128x128xf32>
    %43 = arith.maximumf %41, %42 : vector<128x128xf32>
    %c1 = arith.constant 1 : index
    %c0_16 = arith.constant 0 : index
    %c0_17 = arith.constant 0 : index
    %44 = vector.load %arg2[%c1, %c0_16, %c0_17] : memref<2x128x128xbf16, #tpu.memory_space<vmem>>, vector<1x128x128xbf16>
    %45 = vector.shape_cast %44 : vector<1x128x128xbf16> to vector<128x128xbf16>
    %c1_18 = arith.constant 1 : index
    %c0_19 = arith.constant 0 : index
    %c0_20 = arith.constant 0 : index
    %46 = vector.load %arg3[%c1_18, %c0_19, %c0_20] : memref<2x1x128xf32, #tpu.memory_space<vmem>>, vector<1x1x128xf32>
    %47 = vector.shape_cast %46 : vector<1x1x128xf32> to vector<1x128xf32>
    %48 = arith.truncf %43 : vector<128x128xf32> to vector<128x128xbf16>
    %cst_21 = arith.constant dense<0.000000e+00> : vector<128x128xf32>
    %49 = tpu.matmul %48, %45, %cst_21 {dimension_numbers = #tpu.dot_dimension_numbers<[1], [0], [0], [1], [0, 0, 1, 1], [], []>} : vector<128x128xbf16>, vector<128x128xbf16>, vector<128x128xf32> -> vector<128x128xf32>
    %50 = vector.extract_strided_slice %49 {offsets = [0, 125], sizes = [128, 1], strides = [1, 1]} : vector<128x128xf32> to vector<128x1xf32>
    %51 = vector.extract_strided_slice %49 {offsets = [0, 126], sizes = [128, 1], strides = [1, 1]} : vector<128x128xf32> to vector<128x1xf32>
    %52 = tpu.transpose %50, [1, 0] : vector<128x1xf32> -> vector<1x128xf32>
    %53 = vector.broadcast %51 : vector<128x1xf32> to vector<128x128xf32>
    %54 = vector.broadcast %52 : vector<1x128xf32> to vector<128x128xf32>
    %55 = arith.addf %53, %54 : vector<128x128xf32>
    %cst_22 = arith.constant 2.000000e-01 : f32
    %56 = vector.broadcast %cst_22 : f32 to vector<128x128xf32>
    %57 = arith.mulf %56, %55 : vector<128x128xf32>
    %58 = arith.maximumf %55, %57 : vector<128x128xf32>
    %59 = arith.addf %58, %5 : vector<128x128xf32>
    %cst_23 = arith.constant dense<0xFF800000> : vector<128xf32>
    %60 = vector.multi_reduction <maximumf>, %59, %cst_23 [1] : vector<128x128xf32> to vector<128xf32>
    %61 = vector.shape_cast %60 : vector<128xf32> to vector<128x1xf32>
    %62 = vector.broadcast %61 : vector<128x1xf32> to vector<128x128xf32>
    %63 = arith.subf %59, %62 : vector<128x128xf32>
    %64 = math.exp %63 : vector<128x128xf32>
    %c127_i32_24 = arith.constant 127 : i32
    %65 = vector.broadcast %c127_i32_24 : i32 to vector<128x128xi32>
    %66 = arith.cmpi eq, %6, %65 : vector<128x128xi32>
    %cst_25 = arith.constant 1.000000e+00 : f32
    %67 = vector.broadcast %cst_25 : f32 to vector<128x128xf32>
    %68 = arith.select %66, %67, %49 : vector<128x128xi1>, vector<128x128xf32>
    %69 = arith.truncf %68 : vector<128x128xf32> to vector<128x128xbf16>
    %70 = arith.truncf %64 : vector<128x128xf32> to vector<128x128xbf16>
    %cst_26 = arith.constant dense<0.000000e+00> : vector<128x128xf32>
    %71 = tpu.matmul %70, %69, %cst_26 {dimension_numbers = #tpu.dot_dimension_numbers<[1], [0], [0], [1], [0, 0, 1, 1], [], []>} : vector<128x128xbf16>, vector<128x128xbf16>, vector<128x128xf32> -> vector<128x128xf32>
    %72 = vector.extract_strided_slice %71 {offsets = [0, 127], sizes = [128, 1], strides = [1, 1]} : vector<128x128xf32> to vector<128x1xf32>
    %73 = tpu.reciprocal %72 {approx = true} : vector<128x1xf32> -> vector<128x1xf32>
    %74 = vector.broadcast %73 : vector<128x1xf32> to vector<128x128xf32>
    %75 = arith.mulf %71, %74 : vector<128x128xf32>
    %76 = vector.broadcast %47 : vector<1x128xf32> to vector<128x128xf32>
    %77 = arith.addf %75, %76 : vector<128x128xf32>
    %c0_27 = arith.constant 0 : index
    %c0_28 = arith.constant 0 : index
    %78 = vector.load %arg4[%c0_27, %c0_28] : memref<128x128xf32, #tpu.memory_space<vmem>>, vector<128x128xf32>
    tpu.vector_store %arg4[%c0_27, %c0_28], %77 {strides = array<i32>} : memref<128x128xf32, #tpu.memory_space<vmem>>, vector<128x128xf32>,
    return
  }
}

</mosaic_0001>

<bundles_post_ra>
// kernel: forward.1
= control target key start
LH: loop header
LB: loop body
LE: loop exit
PB: predicated region body
PF: predicated region fallthrough
CT: control target
= control target key end

     0   :  { %v2023_v32 = vmov 126   ;;  %v86_v33 = vlaneseq  ;;  %s2024_s11 = smov 3   ;;  %s2767_s2 = inlined_call_operand.vmem [shape: bf16[2,128,128], index: 2, kind: input, shape index: {}]   ;;  %s2768_s0 = inlined_call_operand.vmem [shape: f32[128,128], index: 0, kind: input, shape index: {}]   ;;  %s2769_s1 = inlined_call_operand.vmem [shape: s8[128,128], index: 1, kind: input, shape index: {}]   ;;  %s2770_s3 = inlined_call_operand.vmem [shape: f32[2,1,128], index: 3, kind: input, shape index: {}]   ;;  %s2771_s4 = inlined_call_operand.vmem [shape: f32[128,128], index: 4, kind: output, shape index: {}]  }
   0x1   :  { %v1879_v0 = vld [vmem:[%s2767_s2] sm:$0xff]   ;;  %v1880_v1 = vld [vmem:[%s2767_s2 + $0x8] sm:$0xff]   ;;  %v1881_v2 = vld [vmem:[%s2767_s2 + $0x10] sm:$0xff]   ;;  %1872 = vset.pattern.permute.xlu1 %v2023_v32  ;;  %1871 = vset.pattern.permute.xlu0 %v2023_v32 }
   0x2   :  { %1740 = vmatprep.subr.bf16.mxu0 %v1879_v0  ;;  %v1882_v3 = vld [vmem:[%s2767_s2 + $0x18] sm:$0xff]   ;;  %v88_v4 = vld [vmem:[%s2768_s0] sm:$0xff]  ;;  %v89_v5 = vld [vmem:[%s2768_s0 + $0x8] sm:$0xff]  ;;  %v2126_v34 = vand.u32 127, %v86_v33 }
   0x3   :  { %1741 = vmatpush3.bf16.msra.mxu0 %v1879_v0  ;;  %v121_v6 = vpack.c.bf16 %v89_v5, %v88_v4  ;;  %v1883_v7 = vld [vmem:[%s2767_s2 + $0x20] sm:$0xff]   ;;  %v1884_v8 = vld [vmem:[%s2767_s2 + $0x28] sm:$0xff]   ;;  %v1885_v9 = vld [vmem:[%s2767_s2 + $0x30] sm:$0xff]  }
   0x4   :  { %1742 = vmatprep.subr.bf16.mxu0 %v1880_v1  ;;  %v1886_v10 = vld [vmem:[%s2767_s2 + $0x38] sm:$0xff]   ;;  %v90_v11 = vld [vmem:[%s2768_s0 + $0x10] sm:$0xff]  ;;  %v92_v13 = vld [vmem:[%s2768_s0 + $0x20] sm:$0xff]  ;;  %vm582_vm0 = vcmp.eq.s32.totalorder %v2126_v34, 127 }
   0x5   :  { %1756 = vmatprep.mubr.bf16.mxu0 %v121_v6  ;;  %v91_v12 = vld [vmem:[%s2768_s0 + $0x18] sm:$0xff]  ;;  %v93_v14 = vld [vmem:[%s2768_s0 + $0x28] sm:$0xff]  ;;  %v94_v17 = vld [vmem:[%s2768_s0 + $0x30] sm:$0xff] }
   0x6   :  { %v122_v15 = vpack.c.bf16 %v91_v12, %v90_v11  ;;  %v123_v16 = vpack.c.bf16 %v93_v14, %v92_v13  ;;  %v95_v18 = vld [vmem:[%s2768_s0 + $0x38] sm:$0xff]  ;;  %v96_v19 = vld [vmem:[%s2768_s0 + $0x40] sm:$0xff]  ;;  %v97_v20 = vld [vmem:[%s2768_s0 + $0x48] sm:$0xff] }
   0x7   :  { %1743 = vmatpush3.bf16.msra.mxu0 %v1880_v1  ;;  %v124_v21 = vpack.c.bf16 %v95_v18, %v94_v17  ;;  %v125_v22 = vpack.c.bf16 %v97_v20, %v96_v19  ;;  %v98_v23 = vld [vmem:[%s2768_s0 + $0x50] sm:$0xff]  ;;  %v99_v24 = vld [vmem:[%s2768_s0 + $0x58] sm:$0xff]  ;;  %v100_v25 = vld [vmem:[%s2768_s0 + $0x60] sm:$0xff] }
   0x8   :  { %1744 = vmatprep.subr.bf16.mxu0 %v1881_v2  ;;  %v101_v26 = vld [vmem:[%s2768_s0 + $0x68] sm:$0xff]  ;;  %v126_v27 = vpack.c.bf16 %v99_v24, %v98_v23  ;;  %v102_v29 = vld [vmem:[%s2768_s0 + $0x70] sm:$0xff]  ;;  %v103_v30 = vld [vmem:[%s2768_s0 + $0x78] sm:$0xff] }
   0x9   :  { %v127_v28 = vpack.c.bf16 %v101_v26, %v100_v25  ;;  %v128_v31 = vpack.c.bf16 %v103_v30, %v102_v29 }
   0xb   :  { %1745 = vmatpush3.bf16.msra.mxu0 %v1881_v2 }
   0xc   :  { %1746 = vmatprep.subr.bf16.mxu0 %v1882_v3 }
   0xf   :  { %1747 = vmatpush3.bf16.msra.mxu0 %v1882_v3 }
  0x10   :  { %1748 = vmatprep.subr.bf16.mxu0 %v1883_v7 }
  0x13   :  { %1749 = vmatpush3.bf16.msra.mxu0 %v1883_v7 }
  0x14   :  { %1750 = vmatprep.subr.bf16.mxu0 %v1884_v8 }
  0x17   :  { %1751 = vmatpush3.bf16.msra.mxu0 %v1884_v8 }
  0x18   :  { %1752 = vmatprep.subr.bf16.mxu0 %v1885_v9 }
  0x1b   :  { %1753 = vmatpush3.bf16.msra.mxu0 %v1885_v9 }
  0x1c   :  { %1754 = vmatprep.subr.bf16.mxu0 %v1886_v10 }
  0x1f   :  { %1755 = vmatpush3.bf16.msra.mxu0 %v1886_v10 }
  0x22   :  { %1757 = vmatmul.mubr.bf16.vlgmr.msra.gmra.mrb[0].mxu0 %v122_v15 }
  0x23   :  { %1760 = vmatprep.mubr.bf16.mxu0 %v123_v16 }
  0x2a   :  { %1761 = vmatmul.mubr.bf16.gmra.mrb[4].mxu0 %v124_v21 }
  0x2b   :  { %1764 = vmatprep.mubr.bf16.mxu0 %v125_v22 }
  0x32   :  { %1765 = vmatmul.mubr.bf16.gmra.mrb[8].mxu0 %v126_v27 }
  0x33   :  { %1768 = vmatprep.mubr.bf16.mxu0 %v127_v28 }
  0x3a   :  { %1769 = vmatmul.mubr.bf16.gmra.mrb[12].mxu0 %v128_v31 }
  0xf5   :  { %v2128_v35 = vpop.f32.mrb[0].mxu0 }
  0xf6   :  { %294 = vrot.lane.b32.xlu1 %v2128_v35, %s2024_s11  ;;  %v2133_v36 = vpop.f32.mrb[1].mxu0  ;;  %v585_v38 = vsel %vm582_vm0, 1.0, %v2128_v35 }
  0xf7   :  { %290 = vrot.lane.b32.xlu0 %v2133_v36, %s2024_s11  ;;  %v2137_v37 = vpop.f32.mrb[2].mxu0  ;;  %v583_v41 = vsel %vm582_vm0, 1.0, %v2133_v36 }
  0xf8   :  { %v586_v39 = vsel %vm582_vm0, 1.0, %v2137_v37  ;;  %v214_v40 = vpop.f32.mrb[3].mxu0 }
  0xf9   :  { %v584_v42 = vsel %vm582_vm0, 1.0, %v214_v40  ;;  %v600_v43 = vpack.c.bf16 %v586_v39, %v585_v38  ;;  %v18_v38 = vld [vmem:[%s2769_s1] sm:$0xff]  ;;  %v2206_v39 = vshrl.u32 %v86_v33, 7 }
  0xfa   :  { %296 = vrot.lane.b32.xlu1 %v2137_v37, %s2024_s11  ;;  %v599_v44 = vpack.c.bf16 %v584_v42, %v583_v41  ;;  %v23_v41 = vunpack.c.1.s8 %v18_v38 }
  0xfb   :  { %292 = vrot.lane.b32.xlu0 %v214_v40, %s2024_s11  ;;  %v436_v42 = vsub.s32 0, %v2206_v39 }
  0xfc   :  { %1772 = vmatprep.subr.bf16.mxu1 %v599_v44 }
  0xfd   :  { %v1762_v45 = vpop.f32.mrb[4].mxu0  ;;  %1773 = vmatpush3.bf16.msra.mxu1 %v599_v44 }
  0xfe   :  { %v227_v46 = vpop.f32.mrb[5].mxu0  ;;  %1774 = vmatprep.subr.bf16.mxu1 %v600_v43  ;;  %v589_v48 = vsel %vm582_vm0, 1.0, %v1762_v45 }
  0xff   :  { %302 = vrot.lane.b32.xlu0 %v1762_v45, %s2024_s11  ;;  %v1763_v47 = vpop.f32.mrb[6].mxu0  ;;  %v587_v51 = vsel %vm582_vm0, 1.0, %v227_v46 }
 0x100   :  { %v590_v49 = vsel %vm582_vm0, 1.0, %v1763_v47  ;;  %304 = vrot.lane.b32.xlu1 %v1763_v47, %s2024_s11  ;;  %v230_v50 = vpop.f32.mrb[7].mxu0 }
 0x101   :  { %v588_v52 = vsel %vm582_vm0, 1.0, %v230_v50  ;;  %1775 = vmatpush3.bf16.msra.mxu1 %v600_v43  ;;  %v602_v53 = vpack.c.bf16 %v590_v49, %v589_v48 }
 0x102   :  { %v601_v54 = vpack.c.bf16 %v588_v52, %v587_v51 }
 0x103   :  { %298 = vrot.lane.b32.xlu0 %v227_v46, %s2024_s11 }
 0x104   :  { %300 = vrot.lane.b32.xlu1 %v230_v50, %s2024_s11  ;;  %1776 = vmatprep.subr.bf16.mxu1 %v601_v54 }
 0x105   :  { %v1766_v55 = vpop.f32.mrb[8].mxu0  ;;  %1777 = vmatpush3.bf16.msra.mxu1 %v601_v54  ;;  %v19_v54 = vld [vmem:[%s2769_s1 + $0x8] sm:$0xff] }
 0x106   :  { %v243_v56 = vpop.f32.mrb[9].mxu0  ;;  %1778 = vmatprep.subr.bf16.mxu1 %v602_v53  ;;  %v593_v58 = vsel %vm582_vm0, 1.0, %v1766_v55 }
 0x107   :  { %310 = vrot.lane.b32.xlu0 %v1766_v55, %s2024_s11  ;;  %v1767_v57 = vpop.f32.mrb[10].mxu0  ;;  %v591_v61 = vsel %vm582_vm0, 1.0, %v243_v56 }
 0x108   :  { %v594_v59 = vsel %vm582_vm0, 1.0, %v1767_v57  ;;  %312 = vrot.lane.b32.xlu1 %v1767_v57, %s2024_s11  ;;  %v246_v60 = vpop.f32.mrb[11].mxu0 }
 0x109   :  { %v592_v62 = vsel %vm582_vm0, 1.0, %v246_v60  ;;  %1779 = vmatpush3.bf16.msra.mxu1 %v602_v53  ;;  %v604_v63 = vpack.c.bf16 %v594_v59, %v593_v58  ;;  %v25_v53 = vunpack.c.3.s8 %v18_v38 }
 0x10a   :  { %v603_v0 = vpack.c.bf16 %v592_v62, %v591_v61 }
 0x10b   :  { %306 = vrot.lane.b32.xlu0 %v243_v56, %s2024_s11 }
 0x10c   :  { %308 = vrot.lane.b32.xlu1 %v246_v60, %s2024_s11  ;;  %1780 = vmatprep.subr.bf16.mxu1 %v603_v0 }
 0x10d   :  { %1781 = vmatpush3.bf16.msra.mxu1 %v603_v0  ;;  %v1770_v1 = vpop.f32.mrb[12].mxu0  ;;  %v26_v0 = vunpack.c.0.s8 %v19_v54 }
 0x10e   :  { %v597_v2 = vsel %vm582_vm0, 1.0, %v1770_v1  ;;  %1782 = vmatprep.subr.bf16.mxu1 %v604_v63  ;;  %v259_v3 = vpop.f32.mrb[13].mxu0 }
 0x10f   :  { %318 = vrot.lane.b32.xlu0 %v1770_v1, %s2024_s11  ;;  %v595_v4 = vsel %vm582_vm0, 1.0, %v259_v3  ;;  %v1771_v5 = vpop.f32.mrb[14].mxu0 }
 0x110   :  { %375 = vperm.xlu1 %1872, %v214_v40   ;;  %v598_v6 = vsel %vm582_vm0, 1.0, %v1771_v5  ;;  %v262_v7 = vpop.f32.mrb[15].mxu0  ;;  %v22_v40 = vunpack.c.0.s8 %v18_v38 }
 0x111   :  { %1783 = vmatpush3.bf16.msra.mxu1 %v604_v63  ;;  %v596_v8 = vsel %vm582_vm0, 1.0, %v262_v7  ;;  %v606_v9 = vpack.c.bf16 %v598_v6, %v597_v2  ;;  %v41_v63 = vcvt.s32.f32 %v25_v53 }
 0x112   :  { %v605_v10 = vpack.c.bf16 %v596_v8, %v595_v4  ;;  %v38_v43 = vcvt.s32.f32 %v22_v40  ;;  %v27_v8 = vunpack.c.1.s8 %v19_v54 }
 0x113   :  { %314 = vrot.lane.b32.xlu0 %v259_v3, %s2024_s11  ;;  %v1628_v6 = vadd.f32 -1.0, %v41_v63 }
 0x114   :  { %379 = vperm.xlu1 %1872, %v2128_v35   ;;  %1784 = vmatprep.subr.bf16.mxu1 %v605_v10  ;;  %v1625_v48 = vadd.f32 -1.0, %v38_v43 }
 0x115   :  { %1785 = vmatpush3.bf16.msra.mxu1 %v605_v10 }
 0x116   :  { %1786 = vmatprep.subr.bf16.mxu1 %v606_v9 }
 0x117   :  { %371 = vperm.xlu0 %1871, %v2133_v36  }
 0x118   :  { %387 = vperm.xlu1 %1872, %v227_v46   ;;  %v24_v46 = vunpack.c.2.s8 %v18_v38  ;;  %v20_v38 = vld [vmem:[%s2769_s1 + $0x10] sm:$0xff] }
 0x119   :  { %1787 = vmatpush3.bf16.msra.mxu1 %v606_v9  ;;  %v32_v63 = vunpack.c.2.s8 %v20_v38 }
 0x11a   :  { %v40_v52 = vcvt.s32.f32 %v24_v46 }
 0x11b   :  { %383 = vperm.xlu0 %1871, %v2137_v37  }
 0x11c   :  { %395 = vperm.xlu1 %1872, %v1762_v45   ;;  %v39_v45 = vcvt.s32.f32 %v23_v41  ;;  %v1627_v62 = vadd.f32 -1.0, %v40_v52  ;;  %v31_v52 = vunpack.c.1.s8 %v20_v38 }
 0x11e   :  { %v1626_v33 = vadd.f32 -1.0, %v39_v45  ;;  %v30_v45 = vunpack.c.0.s8 %v20_v38 }
 0x11f   :  { %391 = vperm.xlu0 %1871, %v230_v50  }
 0x120   :  { %403 = vperm.xlu1 %1872, %v243_v56   ;;  %v2221_v61 = vmul.f32 1e+30, %v1626_v33  ;;  %v46_v33 = vcvt.s32.f32 %v30_v45 }
 0x123   :  { %399 = vperm.xlu0 %1871, %v1763_v47  }
 0x124   :  { %411 = vperm.xlu1 %1872, %v1766_v55   ;;  %v2218_v55 = vmul.f32 1e+30, %v1625_v48 }
 0x127   :  { %407 = vperm.xlu0 %1871, %v246_v60  }
 0x128   :  { %427 = vperm.xlu1 %1872, %v1770_v1  }
 0x12b   :  { %415 = vperm.xlu0 %1871, %v1767_v57  }
 0x12c   :  { %419 = vperm.xlu1 %1872, %v259_v3  }
 0x12f   :  { %431 = vperm.xlu0 %1871, %v1771_v5  }
 0x130   :  { %320 = vrot.lane.b32.xlu1 %v1771_v5, %s2024_s11  ;;  %v2228_v5 = vmul.f32 1e+30, %v1627_v62  ;;  %v47_v62 = vcvt.s32.f32 %v31_v52 }
 0x133   :  { %423 = vperm.xlu0 %1871, %v262_v7  }
 0x134   :  { %316 = vrot.lane.b32.xlu1 %v262_v7, %s2024_s11  ;;  %v42_v7 = vcvt.s32.f32 %v26_v0 }
 0x168   :  { %v295_v12 = vpop.permute.xlu1 %294 }
 0x169   :  { %v291_v11 = vpop.permute.xlu0 %290 }
 0x16a   :  { %338 = vxpose.xlu1.b32.start [1/16] (narrow) %v291_v11, 8 }
 0x16c   :  { %v297_v14 = vpop.permute.xlu1 %296 }
 0x16d   :  { %v293_v13 = vpop.permute.xlu0 %292 }
 0x16e   :  { %339 = vxpose.xlu1.b32.cont [2/16] (narrow) %v293_v13, 8 }
 0x171   :  { %v303_v15 = vpop.permute.xlu0 %302 }
 0x172   :  { %340 = vxpose.xlu1.b32.cont [3/16] (narrow) %v295_v12, 8  ;;  %v305_v16 = vpop.permute.xlu1 %304 }
 0x175   :  { %v299_v17 = vpop.permute.xlu0 %298 }
 0x176   :  { %341 = vxpose.xlu1.b32.cont [4/16] (narrow) %v297_v14, 8  ;;  %v301_v18 = vpop.permute.xlu1 %300  ;;  %v2235_v14 = vmul.f32 1e+30, %v1628_v6 }
 0x179   :  { %v311_v19 = vpop.permute.xlu0 %310 }
 0x17a   :  { %342 = vxpose.xlu1.b32.cont [5/16] (narrow) %v299_v17, 8  ;;  %v313_v20 = vpop.permute.xlu1 %312  ;;  %v28_v17 = vunpack.c.2.s8 %v19_v54 }
 0x17d   :  { %v307_v21 = vpop.permute.xlu0 %306 }
 0x17e   :  { %343 = vxpose.xlu1.b32.cont [6/16] (narrow) %v301_v18, 8  ;;  %v309_v22 = vpop.permute.xlu1 %308 }
 0x181   :  { %v319_v24 = vpop.permute.xlu0 %318 }
 0x182   :  { %344 = vxpose.xlu1.b32.cont [7/16] (narrow) %v303_v15, 8  ;;  %v1629_v15 = vadd.f32 -1.0, %v42_v7 }
 0x185   :  { %v315_v27 = vpop.permute.xlu0 %314 }
 0x186   :  { %345 = vxpose.xlu1.b32.cont [8/16] (narrow) %v305_v16, 8  ;;  %v43_v16 = vcvt.s32.f32 %v27_v8  ;;  %v48_v8 = vcvt.s32.f32 %v32_v63 }
 0x18a   :  { %346 = vxpose.xlu1.b32.cont [9/16] (narrow) %v307_v21, 8 }
 0x18e   :  { %347 = vxpose.xlu1.b32.cont [10/16] (narrow) %v309_v22, 8  ;;  %v2242_v22 = vmul.f32 1e+30, %v1629_v15 }
 0x18f   :  { %v376_v23 = vpop.permute.xlu1 %375 }
 0x192   :  { %348 = vxpose.xlu1.b32.cont [11/16] (narrow) %v311_v19, 8 }
 0x193   :  { %v380_v25 = vpop.permute.xlu1 %379 }
 0x196   :  { %349 = vxpose.xlu1.b32.cont [12/16] (narrow) %v313_v20, 8  ;;  %v372_v49 = vpop.permute.xlu0 %371 }
 0x197   :  { %v388_v26 = vpop.permute.xlu1 %387 }
 0x19a   :  { %350 = vxpose.xlu1.b32.cont [13/16] (narrow) %v315_v27, 8  ;;  %v384_v60 = vpop.permute.xlu0 %383 }
 0x19b   :  { %v2192_v28 = vpop.permute.xlu1 %395 }
 0x19e   :  { %v392_v13 = vpop.permute.xlu0 %391 }
 0x19f   :  { %v2194_v29 = vpop.permute.xlu1 %403 }
 0x1a2   :  { %v400_v40 = vpop.permute.xlu0 %399 }
 0x1a3   :  { %v2196_v30 = vpop.permute.xlu1 %411 }
 0x1a7   :  { %v2198_v31 = vpop.permute.xlu1 %427 }
 0x1ab   :  { %v2200_v35 = vpop.permute.xlu1 %419 }
 0x1af   :  { %v321_v36 = vpop.permute.xlu1 %320 }
 0x1b3   :  { %v317_v37 = vpop.permute.xlu1 %316 }
 0x1b4   :  { %351 = vxpose.xlu1.b32.cont [14/16] (narrow) %v317_v37, 8 }
 0x1b8   :  { %352 = vxpose.xlu1.b32.cont [15/16] (narrow) %v319_v24, 8  ;;  %v44_v24 = vcvt.s32.f32 %v28_v17 }
 0x1ba   :  { %v1631_v43 = vadd.f32 -1.0, %v44_v24 }
 0x1bc   :  { %353 = vxpose.xlu1.b32.end [16/16] (narrow) %v321_v36, 8 }
 0x200   :  { %v354_v44 = vpop.trf.xlu1 }
 0x201   :  { %v2211_v47 = vrot.slane %v354_v44, %v436_v42 }
 0x203   :  { %v438_v50 = vadd.f32 %v2211_v47, %v372_v49  ;;  %v439_v51 = vadd.f32 %v2211_v47, %v376_v23  ;;  %v440_v58 = vadd.f32 %v2211_v47, %v380_v25  ;;  %v441_v4 = vadd.f32 %v2211_v47, %v384_v60 }
 0x204   :  { %v442_v12 = vadd.f32 %v2211_v47, %v388_v26  ;;  %v443_v21 = vadd.f32 %v2211_v47, %v392_v13  ;;  %v1630_v23 = vadd.f32 -1.0, %v43_v16  ;;  %v29_v25 = vunpack.c.3.s8 %v19_v54  ;;  %v21_v16 = vld [vmem:[%s2769_s1 + $0x18] sm:$0xff] }
 0x205   :  { %v454_v56 = vmul.f32 0.2, %v438_v50  ;;  %v455_v57 = vmul.f32 0.2, %v439_v51  ;;  %v456_v3 = vmul.f32 0.2, %v440_v58  ;;  %v444_v37 = vadd.f32 %v2211_v47, %v2192_v28 }
 0x206   :  { %v457_v11 = vmul.f32 0.2, %v441_v4  ;;  %v458_v20 = vmul.f32 0.2, %v442_v12  ;;  %v459_v36 = vmul.f32 0.2, %v443_v21  ;;  %v45_v44 = vcvt.s32.f32 %v29_v25 }
 0x207   :  { %v470_v59 = vmax.f32 %v438_v50, %v454_v56  ;;  %v471_v2 = vmax.f32 %v439_v51, %v455_v57  ;;  %v472_v10 = vmax.f32 %v440_v58, %v456_v3  ;;  %v2253_v41 = vmul.f32 1e+30, %v1630_v23  ;;  %v408_v58 = vpop.permute.xlu0 %407 }
 0x208   :  { %v473_v19 = vmax.f32 %v441_v4, %v457_v11  ;;  %v474_v27 = vmax.f32 %v442_v12, %v458_v20  ;;  %v475_v48 = vmax.f32 %v443_v21, %v459_v36  ;;  %v460_v49 = vmul.f32 0.2, %v444_v37 }
 0x209   :  { %v2224_v1 = vadd.f32 %v470_v59, %v2218_v55  ;;  %v2231_v9 = vadd.f32 %v471_v2, %v2221_v61  ;;  %v2238_v18 = vadd.f32 %v472_v10, %v2228_v5  ;;  %v445_v50 = vadd.f32 %v2211_v47, %v400_v40 }
 0x20a   :  { %v2245_v26 = vadd.f32 %v473_v19, %v2235_v14  ;;  %v2256_v46 = vadd.f32 %v474_v27, %v2242_v22  ;;  %v2260_v28 = vmul.f32 1e+30, %v1631_v43  ;;  %v1632_v51 = vadd.f32 -1.0, %v45_v44 }
 0x20b   :  { %502 = vmax.xlane.f32.xlu0 %v2224_v1  ;;  %v2263_v53 = vadd.f32 %v475_v48, %v2253_v41  ;;  %v476_v54 = vmax.f32 %v444_v37, %v460_v49  ;;  %v461_v56 = vmul.f32 0.2, %v445_v50  ;;  %v446_v57 = vadd.f32 %v2211_v47, %v2194_v29  ;;  %v416_v6 = vpop.permute.xlu0 %415 }
 0x20c   :  { %v2268_v59 = vmul.f32 1e+30, %v1632_v51  ;;  %v1633_v60 = vadd.f32 -1.0, %v46_v33  ;;  %v447_v4 = vadd.f32 %v2211_v47, %v408_v58  ;;  %v1634_v29 = vadd.f32 -1.0, %v47_v62 }
 0x20d   :  { %v2271_v0 = vadd.f32 %v476_v54, %v2260_v28  ;;  %v477_v2 = vmax.f32 %v445_v50, %v461_v56  ;;  %v462_v3 = vmul.f32 0.2, %v446_v57  ;;  %v33_v10 = vunpack.c.3.s8 %v20_v38 }
 0x20e   :  { %v2275_v7 = vmul.f32 1e+30, %v1633_v60  ;;  %v463_v13 = vmul.f32 0.2, %v447_v4  ;;  %v448_v15 = vadd.f32 %v2211_v47, %v2196_v30  ;;  %v2286_v17 = vmul.f32 1e+30, %v1634_v29 }
 0x20f   :  { %504 = vmax.xlane.f32.xlu0 %v2231_v9  ;;  %v2278_v11 = vadd.f32 %v477_v2, %v2268_v59  ;;  %v478_v12 = vmax.f32 %v446_v57, %v462_v3  ;;  %v1635_v19 = vadd.f32 -1.0, %v48_v8  ;;  %v49_v20 = vcvt.s32.f32 %v33_v10  ;;  %v432_v36 = vpop.permute.xlu0 %431 }
 0x210   :  { %v34_v21 = vunpack.c.0.s8 %v21_v16  ;;  %v479_v24 = vmax.f32 %v447_v4, %v463_v13  ;;  %v464_v25 = vmul.f32 0.2, %v448_v15  ;;  %v449_v27 = vadd.f32 %v2211_v47, %v416_v6 }
 0x211   :  { %v2289_v23 = vadd.f32 %v478_v12, %v2275_v7  ;;  %v2293_v30 = vmul.f32 1e+30, %v1635_v19  ;;  %v1636_v37 = vadd.f32 -1.0, %v49_v20  ;;  %v35_v40 = vunpack.c.1.s8 %v21_v16 }
 0x212   :  { %v50_v38 = vcvt.s32.f32 %v34_v21  ;;  %v2296_v43 = vadd.f32 %v479_v24, %v2286_v17  ;;  %v480_v44 = vmax.f32 %v448_v15, %v464_v25  ;;  %v465_v45 = vmul.f32 0.2, %v449_v27 }
 0x213   :  { %506 = vmax.xlane.f32.xlu0 %v2238_v18  ;;  %v450_v48 = vadd.f32 %v2211_v47, %v2200_v35  ;;  %v424_v49 = vpop.permute.xlu0 %423  ;;  %v2301_v50 = vmul.f32 1e+30, %v1636_v37  ;;  %v51_v33 = vcvt.s32.f32 %v35_v40  ;;  %v36_v52 = vunpack.c.2.s8 %v21_v16 }
 0x214   :  { %v1637_v51 = vadd.f32 -1.0, %v50_v38  ;;  %v2304_v54 = vadd.f32 %v480_v44, %v2293_v30  ;;  %v481_v56 = vmax.f32 %v449_v27, %v465_v45  ;;  %v451_v58 = vadd.f32 %v2211_v47, %v424_v49 }
 0x215   :  { %v466_v57 = vmul.f32 0.2, %v450_v48  ;;  %v1638_v35 = vadd.f32 -1.0, %v51_v33  ;;  %v52_v62 = vcvt.s32.f32 %v36_v52  ;;  %v37_v63 = vunpack.c.3.s8 %v21_v16 }
 0x216   :  { %v2308_v60 = vmul.f32 1e+30, %v1637_v51  ;;  %v2311_v2 = vadd.f32 %v481_v56, %v2301_v50  ;;  %v467_v4 = vmul.f32 0.2, %v451_v58  ;;  %v452_v6 = vadd.f32 %v2211_v47, %v2198_v31 }
 0x217   :  { %508 = vmax.xlane.f32.xlu0 %v2245_v26  ;;  %v482_v3 = vmax.f32 %v450_v48, %v466_v57  ;;  %v2316_v29 = vmul.f32 1e+30, %v1638_v35  ;;  %v1639_v8 = vadd.f32 -1.0, %v52_v62  ;;  %v53_v10 = vcvt.s32.f32 %v37_v63 }
 0x218   :  { %v483_v13 = vmax.f32 %v451_v58, %v467_v4  ;;  %v468_v15 = vmul.f32 0.2, %v452_v6  ;;  %v453_v16 = vadd.f32 %v2211_v47, %v432_v36 }
 0x219   :  { %v2319_v12 = vadd.f32 %v482_v3, %v2308_v60  ;;  %v2323_v19 = vmul.f32 1e+30, %v1639_v8  ;;  %v1640_v21 = vadd.f32 -1.0, %v53_v10 }
 0x21a   :  { %v2326_v20 = vadd.f32 %v483_v13, %v2316_v29  ;;  %v484_v31 = vmax.f32 %v452_v6, %v468_v15  ;;  %v469_v24 = vmul.f32 0.2, %v453_v16 }
 0x21b   :  { %510 = vmax.xlane.f32.xlu0 %v2256_v46  ;;  %v2332_v27 = vmul.f32 1e+30, %v1640_v21 }
 0x21c   :  { %v2330_v25 = vadd.f32 %v484_v31, %v2323_v19  ;;  %v485_v37 = vmax.f32 %v453_v16, %v469_v24 }
 0x21e   :  { %v2336_v47 = vadd.f32 %v485_v37, %v2332_v27 }
 0x21f   :  { %512 = vmax.xlane.f32.xlu0 %v2263_v53 }
 0x223   :  { %514 = vmax.xlane.f32.xlu0 %v2271_v0 }
 0x227   :  { %516 = vmax.xlane.f32.xlu0 %v2278_v11 }
 0x22b   :  { %518 = vmax.xlane.f32.xlu0 %v2289_v23 }
 0x22f   :  { %520 = vmax.xlane.f32.xlu0 %v2296_v43 }
 0x233   :  { %522 = vmax.xlane.f32.xlu0 %v2304_v54 }
 0x237   :  { %524 = vmax.xlane.f32.xlu0 %v2311_v2 }
 0x23b   :  { %526 = vmax.xlane.f32.xlu0 %v2319_v12 }
 0x23f   :  { %528 = vmax.xlane.f32.xlu0 %v2326_v20 }
 0x243   :  { %530 = vmax.xlane.f32.xlu0 %v2330_v25 }
 0x247   :  { %532 = vmax.xlane.f32.xlu0 %v2336_v47 }
 0x298   :  { %v503_v36 = vpop.xlane.xlu0 %502 }
 0x299   :  { %v534_v38 = vsub.f32 %v2224_v1, %v503_v36 }
 0x29b   :  { %v550_v40 = vmul.f32 1.442695, %v534_v38 }
 0x29c   :  { %v505_v44 = vpop.xlane.xlu0 %504 }
 0x29d   :  { %v535_v45 = vsub.f32 %v2231_v9, %v505_v44  ;;  %1895 = vpow2.f32 %v550_v40 }
 0x29f   :  { %v552_v48 = vmul.f32 1.442695, %v535_v45 }
 0x2a0   :  { %v507_v49 = vpop.xlane.xlu0 %506 }
 0x2a1   :  { %1897 = vpow2.f32 %v552_v48  ;;  %v536_v51 = vsub.f32 %v2238_v18, %v507_v49 }
 0x2a3   :  { %v554_v33 = vmul.f32 1.442695, %v536_v51 }
 0x2a4   :  { %v509_v52 = vpop.xlane.xlu0 %508 }
 0x2a5   :  { %v537_v56 = vsub.f32 %v2245_v26, %v509_v52  ;;  %1899 = vpow2.f32 %v554_v33 }
 0x2a7   :  { %v556_v57 = vmul.f32 1.442695, %v537_v56  ;;  %v1896_v35 = vpop.eup %1895 }
 0x2a8   :  { %v511_v58 = vpop.xlane.xlu0 %510 }
 0x2a9   :  { %1901 = vpow2.f32 %v556_v57  ;;  %v538_v1 = vsub.f32 %v2256_v46, %v511_v58 }
 0x2ab   :  { %v1898_v62 = vpop.eup %1897  ;;  %v558_v63 = vmul.f32 1.442695, %v538_v1 }
 0x2ac   :  { %v513_v9 = vpop.xlane.xlu0 %512  ;;  %v607_v3 = vpack.c.bf16 %v1898_v62, %v1896_v35 }
 0x2ad   :  { %v539_v4 = vsub.f32 %v2263_v53, %v513_v9  ;;  %1903 = vpow2.f32 %v558_v63 }
 0x2ae   :  { %1788 = vmatprep.mubr.bf16.mxu1 %v607_v3 }
 0x2af   :  { %v560_v6 = vmul.f32 1.442695, %v539_v4  ;;  %v1900_v8 = vpop.eup %1899 }
 0x2b0   :  { %v515_v18 = vpop.xlane.xlu0 %514 }
 0x2b1   :  { %1905 = vpow2.f32 %v560_v6  ;;  %v540_v26 = vsub.f32 %v2271_v0, %v515_v18 }
 0x2b3   :  { %v1902_v10 = vpop.eup %1901  ;;  %v562_v13 = vmul.f32 1.442695, %v540_v26 }
 0x2b4   :  { %v517_v15 = vpop.xlane.xlu0 %516  ;;  %v608_v16 = vpack.c.bf16 %v1902_v10, %v1900_v8 }
 0x2b5   :  { %v541_v46 = vsub.f32 %v2278_v11, %v517_v15  ;;  %1907 = vpow2.f32 %v562_v13 }
 0x2b6   :  { %1789 = vmatmul.mubr.bf16.vlgmr.msra.gmra.mrb[0].mxu1 %v608_v16 }
 0x2b7   :  { %v564_v31 = vmul.f32 1.442695, %v541_v46  ;;  %v1904_v24 = vpop.eup %1903 }
 0x2b8   :  { %v519_v21 = vpop.xlane.xlu0 %518 }
 0x2b9   :  { %1909 = vpow2.f32 %v564_v31  ;;  %v542_v53 = vsub.f32 %v2289_v23, %v519_v21  ;;  %v1888_v21 = vld [vmem:[%s2767_s2 + $0x48] sm:$0xff]  }
 0x2bb   :  { %v1906_v37 = vpop.eup %1905  ;;  %v566_v36 = vmul.f32 1.442695, %v542_v53  ;;  %v1889_v53 = vld [vmem:[%s2767_s2 + $0x50] sm:$0xff]  }
 0x2bc   :  { %v521_v38 = vpop.xlane.xlu0 %520  ;;  %v609_v40 = vpack.c.bf16 %v1906_v37, %v1904_v24  ;;  %v1890_v24 = vld [vmem:[%s2767_s2 + $0x58] sm:$0xff]  }
 0x2bd   :  { %v543_v0 = vsub.f32 %v2296_v43, %v521_v38  ;;  %1911 = vpow2.f32 %v566_v36 }
 0x2be   :  { %1792 = vmatprep.mubr.bf16.mxu1 %v609_v40 }
 0x2bf   :  { %v568_v44 = vmul.f32 1.442695, %v543_v0  ;;  %v1908_v48 = vpop.eup %1907 }
 0x2c0   :  { %v523_v45 = vpop.xlane.xlu0 %522 }
 0x2c1   :  { %1913 = vpow2.f32 %v568_v44  ;;  %v544_v11 = vsub.f32 %v2304_v54, %v523_v45 }
 0x2c3   :  { %v1910_v49 = vpop.eup %1909  ;;  %v570_v51 = vmul.f32 1.442695, %v544_v11 }
 0x2c4   :  { %v525_v33 = vpop.xlane.xlu0 %524  ;;  %v610_v52 = vpack.c.bf16 %v1910_v49, %v1908_v48  ;;  %v1891_v48 = vld [vmem:[%s2767_s2 + $0x60] sm:$0xff]  }
 0x2c5   :  { %v545_v23 = vsub.f32 %v2311_v2, %v525_v33  ;;  %1915 = vpow2.f32 %v570_v51 }
 0x2c6   :  { %1793 = vmatmul.mubr.bf16.gmra.mrb[4].mxu1 %v610_v52 }
 0x2c7   :  { %v572_v56 = vmul.f32 1.442695, %v545_v23  ;;  %v1912_v58 = vpop.eup %1911  ;;  %v1892_v23 = vld [vmem:[%s2767_s2 + $0x68] sm:$0xff]  }
 0x2c8   :  { %v527_v57 = vpop.xlane.xlu0 %526 }
 0x2c9   :  { %1917 = vpow2.f32 %v572_v56  ;;  %v546_v43 = vsub.f32 %v2319_v12, %v527_v57  ;;  %v1893_v56 = vld [vmem:[%s2767_s2 + $0x70] sm:$0xff]   ;;  %v1894_v57 = vld [vmem:[%s2767_s2 + $0x78] sm:$0xff]  }
 0x2cb   :  { %v1914_v1 = vpop.eup %1913  ;;  %v574_v35 = vmul.f32 1.442695, %v546_v43 }
 0x2cc   :  { %v529_v62 = vpop.xlane.xlu0 %528  ;;  %v611_v63 = vpack.c.bf16 %v1914_v1, %v1912_v58 }
 0x2cd   :  { %v547_v54 = vsub.f32 %v2326_v20, %v529_v62  ;;  %1919 = vpow2.f32 %v574_v35 }
 0x2ce   :  { %1796 = vmatprep.mubr.bf16.mxu1 %v611_v63 }
 0x2cf   :  { %v576_v9 = vmul.f32 1.442695, %v547_v54  ;;  %v1916_v4 = vpop.eup %1915 }
 0x2d0   :  { %v531_v3 = vpop.xlane.xlu0 %530 }
 0x2d1   :  { %1921 = vpow2.f32 %v576_v9  ;;  %v548_v2 = vsub.f32 %v2330_v25, %v531_v3  ;;  %v2025_v25 = vmov 127  }
 0x2d2   :  { %1874 = vset.pattern.permute.xlu1 %v2025_v25  ;;  %1873 = vset.pattern.permute.xlu0 %v2025_v25 }
 0x2d3   :  { %v1918_v6 = vpop.eup %1917  ;;  %v578_v18 = vmul.f32 1.442695, %v548_v2 }
 0x2d4   :  { %v533_v26 = vpop.xlane.xlu0 %532  ;;  %v612_v8 = vpack.c.bf16 %v1918_v6, %v1916_v4 }
 0x2d5   :  { %v549_v12 = vsub.f32 %v2336_v47, %v533_v26  ;;  %1923 = vpow2.f32 %v578_v18  ;;  %v1887_v47 = vld [vmem:[%s2767_s2 + $0x40] sm:$0xff]  }
 0x2d6   :  { %1797 = vmatmul.mubr.bf16.gmra.mrb[8].mxu1 %v612_v8  ;;  %1804 = vmatprep.subr.bf16.mxu0 %v1887_v47 }
 0x2d7   :  { %v580_v10 = vmul.f32 1.442695, %v549_v12  ;;  %v1920_v13 = vpop.eup %1919  ;;  %1805 = vmatpush3.bf16.msra.mxu0 %v1887_v47 }
 0x2d8   :  { %1806 = vmatprep.subr.bf16.mxu0 %v1888_v21 }
 0x2d9   :  { %1925 = vpow2.f32 %v580_v10 }
 0x2db   :  { %v1922_v20 = vpop.eup %1921  ;;  %1807 = vmatpush3.bf16.msra.mxu0 %v1888_v21 }
 0x2dc   :  { %v613_v15 = vpack.c.bf16 %v1922_v20, %v1920_v13  ;;  %1808 = vmatprep.subr.bf16.mxu0 %v1889_v53 }
 0x2de   :  { %1800 = vmatprep.mubr.bf16.mxu1 %v613_v15 }
 0x2df   :  { %v1924_v16 = vpop.eup %1923  ;;  %1809 = vmatpush3.bf16.msra.mxu0 %v1889_v53 }
 0x2e0   :  { %1810 = vmatprep.subr.bf16.mxu0 %v1890_v24 }
 0x2e3   :  { %v1926_v46 = vpop.eup %1925  ;;  %1811 = vmatpush3.bf16.msra.mxu0 %v1890_v24 }
 0x2e4   :  { %v614_v31 = vpack.c.bf16 %v1926_v46, %v1924_v16  ;;  %1812 = vmatprep.subr.bf16.mxu0 %v1891_v48 }
 0x2e6   :  { %1801 = vmatmul.mubr.bf16.gmra.mrb[12].mxu1 %v614_v31  ;;  %v2434_v31 = vld [vmem:[%s2770_s3] ss:$0 sm:$0xff] }
 0x2e7   :  { %1813 = vmatpush3.bf16.msra.mxu0 %v1891_v48 }
 0x2e8   :  { %1814 = vmatprep.subr.bf16.mxu0 %v1892_v23 }
 0x2eb   :  { %1815 = vmatpush3.bf16.msra.mxu0 %v1892_v23 }
 0x2ec   :  { %1816 = vmatprep.subr.bf16.mxu0 %v1893_v56 }
 0x2ef   :  { %1817 = vmatpush3.bf16.msra.mxu0 %v1893_v56 }
 0x2f0   :  { %1818 = vmatprep.subr.bf16.mxu0 %v1894_v57 }
 0x2f3   :  { %1819 = vmatpush3.bf16.msra.mxu0 %v1894_v57 }
 0x389   :  { %v2369_v37 = vpop.f32.mrb[0].mxu1 }
 0x38a   :  { %1927 = vrcp.f32 %v2369_v37  ;;  %v2372_v36 = vpop.f32.mrb[1].mxu1 }
 0x38b   :  { %1929 = vrcp.f32 %v2372_v36  ;;  %v2375_v38 = vpop.f32.mrb[2].mxu1 }
 0x38c   :  { %v2377_v40 = vpop.f32.mrb[3].mxu1 }
 0x38d   :  { %1931 = vrcp.f32 %v2377_v40 }
 0x38e   :  { %1933 = vrcp.f32 %v2375_v38 }
 0x394   :  { %v1928_v0 = vpop.eup %1927 }
 0x395   :  { %v1930_v44 = vpop.eup %1929  ;;  %740 = vperm.xlu1 %1874, %v1928_v0  }
 0x396   :  { %730 = vperm.xlu0 %1873, %v1930_v44  }
 0x397   :  { %v1932_v45 = vpop.eup %1931 }
 0x398   :  { %v1934_v33 = vpop.eup %1933 }
 0x399   :  { %735 = vperm.xlu1 %1874, %v1932_v45   ;;  %v2381_v11 = vpop.f32.mrb[4].mxu1 }
 0x39a   :  { %v2386_v49 = vpop.f32.mrb[5].mxu1 }
 0x39b   :  { %1935 = vrcp.f32 %v2386_v49  ;;  %v2389_v51 = vpop.f32.mrb[6].mxu1 }
 0x39c   :  { %v2391_v52 = vpop.f32.mrb[7].mxu1 }
 0x39d   :  { %1937 = vrcp.f32 %v2391_v52  ;;  %745 = vperm.xlu1 %1874, %v1934_v33  }
 0x39e   :  { %1939 = vrcp.f32 %v2381_v11 }
 0x39f   :  { %1941 = vrcp.f32 %v2389_v51 }
 0x3a5   :  { %v1936_v43 = vpop.eup %1935 }
 0x3a6   :  { %750 = vperm.xlu0 %1873, %v1936_v43  }
 0x3a7   :  { %v1938_v58 = vpop.eup %1937 }
 0x3a8   :  { %755 = vperm.xlu1 %1874, %v1938_v58   ;;  %v1940_v1 = vpop.eup %1939 }
 0x3a9   :  { %v2405_v35 = vpop.f32.mrb[8].mxu1  ;;  %v1942_v63 = vpop.eup %1941 }
 0x3aa   :  { %760 = vperm.xlu0 %1873, %v1940_v1   ;;  %v2407_v62 = vpop.f32.mrb[9].mxu1 }
 0x3ab   :  { %1943 = vrcp.f32 %v2407_v62  ;;  %v2410_v54 = vpop.f32.mrb[10].mxu1 }
 0x3ac   :  { %765 = vperm.xlu1 %1874, %v1942_v63   ;;  %v2412_v9 = vpop.f32.mrb[11].mxu1 }
 0x3ad   :  { %1945 = vrcp.f32 %v2412_v9 }
 0x3ae   :  { %1947 = vrcp.f32 %v2405_v35 }
 0x3af   :  { %1949 = vrcp.f32 %v2410_v54 }
 0x3b5   :  { %v1944_v3 = vpop.eup %1943 }
 0x3b6   :  { %770 = vperm.xlu0 %1873, %v1944_v3  }
 0x3b7   :  { %v1946_v2 = vpop.eup %1945 }
 0x3b8   :  { %775 = vperm.xlu1 %1874, %v1946_v2   ;;  %v1948_v4 = vpop.eup %1947 }
 0x3b9   :  { %v2417_v6 = vpop.f32.mrb[12].mxu1  ;;  %v1950_v26 = vpop.eup %1949 }
 0x3ba   :  { %780 = vperm.xlu0 %1873, %v1948_v4   ;;  %v2419_v18 = vpop.f32.mrb[13].mxu1 }
 0x3bb   :  { %1951 = vrcp.f32 %v2419_v18  ;;  %v2422_v8 = vpop.f32.mrb[14].mxu1 }
 0x3bc   :  { %785 = vperm.xlu1 %1874, %v1950_v26   ;;  %v2424_v12 = vpop.f32.mrb[15].mxu1 }
 0x3bd   :  { %1953 = vrcp.f32 %v2424_v12 }
 0x3be   :  { %1955 = vrcp.f32 %v2417_v6 }
 0x3bf   :  { %1957 = vrcp.f32 %v2422_v8 }
 0x3c5   :  { %v1952_v10 = vpop.eup %1951 }
 0x3c6   :  { %790 = vperm.xlu0 %1873, %v1952_v10  }
 0x3c7   :  { %v1954_v13 = vpop.eup %1953 }
 0x3c8   :  { %795 = vperm.xlu1 %1874, %v1954_v13   ;;  %v1956_v20 = vpop.eup %1955 }
 0x3c9   :  { %v1958_v15 = vpop.eup %1957 }
 0x3ca   :  { %800 = vperm.xlu0 %1873, %v1956_v20  }
 0x3cc   :  { %805 = vperm.xlu1 %1874, %v1958_v15  }
 0x3ce   :  { %1875 = vset.pattern.permute.xlu0 %v2023_v32 }
 0x3d0   :  { %1876 = vset.pattern.permute.xlu1 %v2023_v32 }
 0x414   :  { %v741_v16 = vpop.permute.xlu1 %740 }
 0x415   :  { %v731_v46 = vpop.permute.xlu0 %730  ;;  %v810_v53 = vmul.f32 %v2369_v37, %v741_v16 }
 0x416   :  { %v808_v47 = vmul.f32 %v731_v46, %v2372_v36 }
 0x417   :  { %v832_v32 = vadd.f32 %v2434_v31, %v810_v53 }
 0x418   :  { %v736_v21 = vpop.permute.xlu1 %735  ;;  %v830_v24 = vadd.f32 %v2434_v31, %v808_v47 }
 0x419   :  { %v809_v0 = vmul.f32 %v736_v21, %v2377_v40  ;;  %v848_v36 = vmax.f32 %v832_v32, 0.0 }
 0x41a   :  { %v846_v48 = vmax.f32 %v830_v24, 0.0 }
 0x41b   :  { %v831_v44 = vadd.f32 %v2434_v31, %v809_v0 }
 0x41c   :  { %v746_v45 = vpop.permute.xlu1 %745 }
 0x41d   :  { %v847_v33 = vmax.f32 %v831_v44, 0.0  ;;  %v811_v23 = vmul.f32 %v2375_v38, %v746_v45 }
 0x41f   :  { %v833_v56 = vadd.f32 %v2434_v31, %v811_v23  ;;  %v881_v57 = vpack.c.bf16 %v847_v33, %v846_v48 }
 0x421   :  { %v849_v43 = vmax.f32 %v833_v56, 0.0  ;;  %1820 = vmatprep.mubr.bf16.mxu0 %v881_v57 }
 0x423   :  { %v882_v37 = vpack.c.bf16 %v849_v43, %v848_v36 }
 0x425   :  { %1821 = vmatmul.mubr.bf16.vlgmr.msra.gmra.mrb[16].mxu0 %v882_v37  ;;  %v751_v58 = vpop.permute.xlu0 %750 }
 0x426   :  { %v812_v40 = vmul.f32 %v751_v58, %v2386_v49 }
 0x427   :  { %v756_v1 = vpop.permute.xlu1 %755 }
 0x428   :  { %v834_v63 = vadd.f32 %v2434_v31, %v812_v40  ;;  %v813_v3 = vmul.f32 %v756_v1, %v2391_v52 }
 0x429   :  { %v761_v2 = vpop.permute.xlu0 %760 }
 0x42a   :  { %v835_v4 = vadd.f32 %v2434_v31, %v813_v3  ;;  %v814_v38 = vmul.f32 %v2381_v11, %v761_v2  ;;  %v850_v10 = vmax.f32 %v834_v63, 0.0 }
 0x42b   :  { %v766_v26 = vpop.permute.xlu1 %765 }
 0x42c   :  { %v851_v13 = vmax.f32 %v835_v4, 0.0  ;;  %v836_v20 = vadd.f32 %v2434_v31, %v814_v38  ;;  %v815_v15 = vmul.f32 %v2389_v51, %v766_v26 }
 0x42e   :  { %v837_v16 = vadd.f32 %v2434_v31, %v815_v15  ;;  %v883_v49 = vpack.c.bf16 %v851_v13, %v850_v10  ;;  %v852_v46 = vmax.f32 %v836_v20, 0.0 }
 0x430   :  { %v853_v47 = vmax.f32 %v837_v16, 0.0  ;;  %1824 = vmatprep.mubr.bf16.mxu0 %v883_v49 }
 0x432   :  { %v884_v21 = vpack.c.bf16 %v853_v47, %v852_v46 }
 0x434   :  { %1825 = vmatmul.mubr.bf16.gmra.mrb[20].mxu0 %v884_v21 }
 0x435   :  { %v771_v52 = vpop.permute.xlu0 %770 }
 0x436   :  { %v816_v53 = vmul.f32 %v771_v52, %v2407_v62 }
 0x437   :  { %v776_v24 = vpop.permute.xlu1 %775 }
 0x438   :  { %v838_v11 = vadd.f32 %v2434_v31, %v816_v53  ;;  %v817_v0 = vmul.f32 %v776_v24, %v2412_v9 }
 0x439   :  { %v781_v44 = vpop.permute.xlu0 %780 }
 0x43a   :  { %v839_v45 = vadd.f32 %v2434_v31, %v817_v0  ;;  %v818_v51 = vmul.f32 %v2405_v35, %v781_v44  ;;  %v854_v48 = vmax.f32 %v838_v11, 0.0 }
 0x43b   :  { %v786_v32 = vpop.permute.xlu1 %785 }
 0x43c   :  { %v855_v33 = vmax.f32 %v839_v45, 0.0  ;;  %v840_v23 = vadd.f32 %v2434_v31, %v818_v51  ;;  %v819_v56 = vmul.f32 %v2410_v54, %v786_v32 }
 0x43e   :  { %v841_v57 = vadd.f32 %v2434_v31, %v819_v56  ;;  %v885_v62 = vpack.c.bf16 %v855_v33, %v854_v48  ;;  %v856_v36 = vmax.f32 %v840_v23, 0.0 }
 0x440   :  { %v857_v43 = vmax.f32 %v841_v57, 0.0  ;;  %1828 = vmatprep.mubr.bf16.mxu0 %v885_v62 }
 0x442   :  { %v886_v37 = vpack.c.bf16 %v857_v43, %v856_v36 }
 0x444   :  { %1829 = vmatmul.mubr.bf16.gmra.mrb[24].mxu0 %v886_v37 }
 0x445   :  { %v791_v9 = vpop.permute.xlu0 %790 }
 0x446   :  { %v820_v58 = vmul.f32 %v791_v9, %v2419_v18 }
 0x447   :  { %v796_v40 = vpop.permute.xlu1 %795 }
 0x448   :  { %v842_v35 = vadd.f32 %v2434_v31, %v820_v58  ;;  %v821_v1 = vmul.f32 %v796_v40, %v2424_v12 }
 0x449   :  { %v801_v63 = vpop.permute.xlu0 %800 }
 0x44a   :  { %v843_v3 = vadd.f32 %v2434_v31, %v821_v1  ;;  %v822_v54 = vmul.f32 %v2417_v6, %v801_v63  ;;  %v858_v4 = vmax.f32 %v842_v35, 0.0 }
 0x44b   :  { %v806_v2 = vpop.permute.xlu1 %805 }
 0x44c   :  { %v859_v38 = vmax.f32 %v843_v3, 0.0  ;;  %v844_v26 = vadd.f32 %v2434_v31, %v822_v54  ;;  %v823_v10 = vmul.f32 %v2422_v8, %v806_v2 }
 0x44e   :  { %v845_v13 = vadd.f32 %v2434_v31, %v823_v10  ;;  %v887_v18 = vpack.c.bf16 %v859_v38, %v858_v4  ;;  %v860_v20 = vmax.f32 %v844_v26, 0.0 }
 0x450   :  { %v861_v15 = vmax.f32 %v845_v13, 0.0  ;;  %1832 = vmatprep.mubr.bf16.mxu0 %v887_v18 }
 0x452   :  { %v888_v16 = vpack.c.bf16 %v861_v15, %v860_v20 }
 0x454   :  { %1833 = vmatmul.mubr.bf16.gmra.mrb[28].mxu0 %v888_v16 }
 0x4f8   :  { %v1822_v12 = vpop.f32.mrb[16].mxu0 }
 0x4f9   :  { %v2468_v49 = vpop.f32.mrb[17].mxu0  ;;  %1054 = vrot.lane.b32.xlu0 %v1822_v12, %s2024_s11  ;;  %v1344_v46 = vsel %vm582_vm0, 1.0, %v1822_v12 }
 0x4fa   :  { %v2471_v6 = vpop.f32.mrb[18].mxu0  ;;  %v1342_v47 = vsel %vm582_vm0, 1.0, %v2468_v49 }
 0x4fb   :  { %v1345_v8 = vsel %vm582_vm0, 1.0, %v2471_v6  ;;  %v974_v31 = vpop.f32.mrb[19].mxu0  ;;  %1056 = vrot.lane.b32.xlu1 %v2471_v6, %s2024_s11 }
 0x4fc   :  { %v1343_v21 = vsel %vm582_vm0, 1.0, %v974_v31  ;;  %v1359_v52 = vpack.c.bf16 %v1345_v8, %v1344_v46 }
 0x4fd   :  { %1050 = vrot.lane.b32.xlu0 %v2468_v49, %s2024_s11  ;;  %v1358_v53 = vpack.c.bf16 %v1343_v21, %v1342_v47 }
 0x4ff   :  { %1836 = vmatprep.subr.bf16.mxu1 %v1358_v53  ;;  %1052 = vrot.lane.b32.xlu1 %v974_v31, %s2024_s11 }
 0x500   :  { %1837 = vmatpush3.bf16.msra.mxu1 %v1358_v53 }
 0x501   :  { %1838 = vmatprep.subr.bf16.mxu1 %v1359_v52 }
 0x504   :  { %1839 = vmatpush3.bf16.msra.mxu1 %v1359_v52 }
 0x507   :  { %v1826_v24 = vpop.f32.mrb[20].mxu0 }
 0x508   :  { %v987_v11 = vpop.f32.mrb[21].mxu0  ;;  %1062 = vrot.lane.b32.xlu0 %v1826_v24, %s2024_s11  ;;  %v1348_v44 = vsel %vm582_vm0, 1.0, %v1826_v24 }
 0x509   :  { %v1827_v0 = vpop.f32.mrb[22].mxu0  ;;  %v1346_v32 = vsel %vm582_vm0, 1.0, %v987_v11 }
 0x50a   :  { %v1349_v45 = vsel %vm582_vm0, 1.0, %v1827_v0  ;;  %v990_v51 = vpop.f32.mrb[23].mxu0  ;;  %1064 = vrot.lane.b32.xlu1 %v1827_v0, %s2024_s11 }
 0x50b   :  { %v1347_v48 = vsel %vm582_vm0, 1.0, %v990_v51  ;;  %v1361_v33 = vpack.c.bf16 %v1349_v45, %v1348_v44 }
 0x50c   :  { %1058 = vrot.lane.b32.xlu0 %v987_v11, %s2024_s11  ;;  %v1360_v23 = vpack.c.bf16 %v1347_v48, %v1346_v32 }
 0x50e   :  { %1840 = vmatprep.subr.bf16.mxu1 %v1360_v23  ;;  %1060 = vrot.lane.b32.xlu1 %v990_v51, %s2024_s11 }
 0x50f   :  { %1841 = vmatpush3.bf16.msra.mxu1 %v1360_v23 }
 0x510   :  { %1842 = vmatprep.subr.bf16.mxu1 %v1361_v33 }
 0x513   :  { %1843 = vmatpush3.bf16.msra.mxu1 %v1361_v33 }
 0x517   :  { %v1830_v56 = vpop.f32.mrb[24].mxu0 }
 0x518   :  { %v1003_v57 = vpop.f32.mrb[25].mxu0  ;;  %1070 = vrot.lane.b32.xlu0 %v1830_v56, %s2024_s11  ;;  %v1352_v36 = vsel %vm582_vm0, 1.0, %v1830_v56 }
 0x519   :  { %v1831_v62 = vpop.f32.mrb[26].mxu0  ;;  %v1350_v9 = vsel %vm582_vm0, 1.0, %v1003_v57 }
 0x51a   :  { %v1353_v43 = vsel %vm582_vm0, 1.0, %v1831_v62  ;;  %v1006_v37 = vpop.f32.mrb[27].mxu0  ;;  %1072 = vrot.lane.b32.xlu1 %v1831_v62, %s2024_s11 }
 0x51b   :  { %v1351_v58 = vsel %vm582_vm0, 1.0, %v1006_v37  ;;  %v1363_v40 = vpack.c.bf16 %v1353_v43, %v1352_v36 }
 0x51c   :  { %1066 = vrot.lane.b32.xlu0 %v1003_v57, %s2024_s11  ;;  %v1362_v35 = vpack.c.bf16 %v1351_v58, %v1350_v9 }
 0x51e   :  { %1844 = vmatprep.subr.bf16.mxu1 %v1362_v35  ;;  %1068 = vrot.lane.b32.xlu1 %v1006_v37, %s2024_s11 }
 0x51f   :  { %1845 = vmatpush3.bf16.msra.mxu1 %v1362_v35 }
 0x520   :  { %1846 = vmatprep.subr.bf16.mxu1 %v1363_v40 }
 0x522   :  { %1135 = vperm.xlu1 %1876, %v974_v31  }
 0x523   :  { %1847 = vmatpush3.bf16.msra.mxu1 %v1363_v40 }
 0x526   :  { %1139 = vperm.xlu1 %1876, %v1822_v12  }
 0x527   :  { %v1834_v1 = vpop.f32.mrb[28].mxu0 }
 0x528   :  { %1078 = vrot.lane.b32.xlu0 %v1834_v1, %s2024_s11  ;;  %v1019_v63 = vpop.f32.mrb[29].mxu0  ;;  %v1356_v54 = vsel %vm582_vm0, 1.0, %v1834_v1 }
 0x529   :  { %v1835_v3 = vpop.f32.mrb[30].mxu0  ;;  %v1354_v38 = vsel %vm582_vm0, 1.0, %v1019_v63 }
 0x52a   :  { %v1357_v2 = vsel %vm582_vm0, 1.0, %v1835_v3  ;;  %1147 = vperm.xlu1 %1876, %v987_v11   ;;  %v1022_v4 = vpop.f32.mrb[31].mxu0 }
 0x52b   :  { %v1355_v26 = vsel %vm582_vm0, 1.0, %v1022_v4  ;;  %v1365_v10 = vpack.c.bf16 %v1357_v2, %v1356_v54 }
 0x52c   :  { %v1364_v13 = vpack.c.bf16 %v1355_v26, %v1354_v38  ;;  %1074 = vrot.lane.b32.xlu0 %v1019_v63, %s2024_s11 }
 0x52e   :  { %1155 = vperm.xlu1 %1876, %v1826_v24   ;;  %1848 = vmatprep.subr.bf16.mxu1 %v1364_v13 }
 0x52f   :  { %1849 = vmatpush3.bf16.msra.mxu1 %v1364_v13 }
 0x530   :  { %1131 = vperm.xlu0 %1875, %v2468_v49   ;;  %1850 = vmatprep.subr.bf16.mxu1 %v1365_v10 }
 0x532   :  { %1163 = vperm.xlu1 %1876, %v1003_v57  }
 0x533   :  { %1851 = vmatpush3.bf16.msra.mxu1 %v1365_v10 }
 0x534   :  { %1143 = vperm.xlu0 %1875, %v2471_v6  }
 0x536   :  { %1171 = vperm.xlu1 %1876, %v1830_v56  }
 0x538   :  { %1151 = vperm.xlu0 %1875, %v990_v51  }
 0x53a   :  { %1187 = vperm.xlu1 %1876, %v1834_v1  }
 0x53c   :  { %1159 = vperm.xlu0 %1875, %v1827_v0  }
 0x53e   :  { %1179 = vperm.xlu1 %1876, %v1019_v63  }
 0x540   :  { %1167 = vperm.xlu0 %1875, %v1006_v37  }
 0x542   :  { %1080 = vrot.lane.b32.xlu1 %v1835_v3, %s2024_s11 }
 0x544   :  { %1175 = vperm.xlu0 %1875, %v1831_v62  }
 0x546   :  { %1076 = vrot.lane.b32.xlu1 %v1022_v4, %s2024_s11 }
 0x548   :  { %1191 = vperm.xlu0 %1875, %v1835_v3  }
 0x54c   :  { %1183 = vperm.xlu0 %1875, %v1022_v4  }
 0x550   :  { %1878 = vset.pattern.permute.xlu0 %v2025_v25 }
 0x56b   :  { %v1055_v34 = vpop.permute.xlu0 %1054 }
 0x56d   :  { %v1057_v18 = vpop.permute.xlu1 %1056 }
 0x56f   :  { %v1051_v20 = vpop.permute.xlu0 %1050 }
 0x570   :  { %1098 = vxpose.xlu1.b32.start [1/16] (narrow) %v1051_v20, 8 }
 0x571   :  { %v1053_v15 = vpop.permute.xlu1 %1052 }
 0x574   :  { %1099 = vxpose.xlu1.b32.cont [2/16] (narrow) %v1053_v15, 8 }
 0x578   :  { %1100 = vxpose.xlu1.b32.cont [3/16] (narrow) %v1055_v34, 8 }
 0x57a   :  { %v1063_v16 = vpop.permute.xlu0 %1062 }
 0x57c   :  { %1101 = vxpose.xlu1.b32.cont [4/16] (narrow) %v1057_v18, 8  ;;  %v1065_v12 = vpop.permute.xlu1 %1064 }
 0x57e   :  { %v1059_v49 = vpop.permute.xlu0 %1058 }
 0x580   :  { %1102 = vxpose.xlu1.b32.cont [5/16] (narrow) %v1059_v49, 8  ;;  %v1061_v6 = vpop.permute.xlu1 %1060 }
 0x584   :  { %1103 = vxpose.xlu1.b32.cont [6/16] (narrow) %v1061_v6, 8 }
 0x588   :  { %1104 = vxpose.xlu1.b32.cont [7/16] (narrow) %v1063_v16, 8 }
 0x58a   :  { %v1071_v46 = vpop.permute.xlu0 %1070 }
 0x58c   :  { %1105 = vxpose.xlu1.b32.cont [8/16] (narrow) %v1065_v12, 8  ;;  %v1073_v8 = vpop.permute.xlu1 %1072 }
 0x58e   :  { %v1067_v31 = vpop.permute.xlu0 %1066 }
 0x590   :  { %1106 = vxpose.xlu1.b32.cont [9/16] (narrow) %v1067_v31, 8  ;;  %v1069_v47 = vpop.permute.xlu1 %1068 }
 0x594   :  { %1107 = vxpose.xlu1.b32.cont [10/16] (narrow) %v1069_v47, 8 }
 0x598   :  { %1108 = vxpose.xlu1.b32.cont [11/16] (narrow) %v1071_v46, 8 }
 0x59a   :  { %v1079_v21 = vpop.permute.xlu0 %1078 }
 0x59c   :  { %1109 = vxpose.xlu1.b32.cont [12/16] (narrow) %v1073_v8, 8 }
 0x59e   :  { %v1075_v52 = vpop.permute.xlu0 %1074 }
 0x5a0   :  { %1110 = vxpose.xlu1.b32.cont [13/16] (narrow) %v1075_v52, 8 }
 0x5a1   :  { %v1136_v53 = vpop.permute.xlu1 %1135 }
 0x5a5   :  { %v1140_v24 = vpop.permute.xlu1 %1139 }
 0x5a9   :  { %v1148_v11 = vpop.permute.xlu1 %1147 }
 0x5ad   :  { %v1156_v0 = vpop.permute.xlu1 %1155 }
 0x5af   :  { %v1132_v57 = vpop.permute.xlu0 %1131 }
 0x5b1   :  { %v1164_v44 = vpop.permute.xlu1 %1163 }
 0x5b3   :  { %v1144_v40 = vpop.permute.xlu0 %1143 }
 0x5b5   :  { %v1172_v45 = vpop.permute.xlu1 %1171 }
 0x5b7   :  { %v1152_v2 = vpop.permute.xlu0 %1151 }
 0x5b9   :  { %v2527_v51 = vpop.permute.xlu1 %1187 }
 0x5bb   :  { %v1160_v18 = vpop.permute.xlu0 %1159 }
 0x5bd   :  { %v2529_v32 = vpop.permute.xlu1 %1179 }
 0x5bf   :  { %v1168_v46 = vpop.permute.xlu0 %1167 }
 0x5c1   :  { %v1081_v48 = vpop.permute.xlu1 %1080 }
 0x5c5   :  { %v1077_v33 = vpop.permute.xlu1 %1076 }
 0x5c6   :  { %1111 = vxpose.xlu1.b32.cont [14/16] (narrow) %v1077_v33, 8 }
 0x5ca   :  { %1112 = vxpose.xlu1.b32.cont [15/16] (narrow) %v1079_v21, 8  ;;  %v1176_v21 = vpop.permute.xlu0 %1175 }
 0x5ce   :  { %1113 = vxpose.xlu1.b32.end [16/16] (narrow) %v1081_v48, 8  ;;  %v1192_v48 = vpop.permute.xlu0 %1191 }
 0x5ec   :  { %1877 = vset.pattern.permute.xlu1 %v2025_v25 }
 0x612   :  { %v1114_v23 = vpop.trf.xlu1 }
 0x613   :  { %v2534_v56 = vrot.slane %v1114_v23, %v436_v42 }
 0x615   :  { %v1198_v62 = vadd.f32 %v2534_v56, %v1132_v57  ;;  %v1199_v36 = vadd.f32 %v2534_v56, %v1136_v53  ;;  %v1200_v9 = vadd.f32 %v2534_v56, %v1140_v24  ;;  %v1201_v39 = vadd.f32 %v2534_v56, %v1144_v40  ;;  %v1184_v57 = vpop.permute.xlu0 %1183 }
 0x616   :  { %v1202_v54 = vadd.f32 %v2534_v56, %v1148_v11  ;;  %v1203_v26 = vadd.f32 %v2534_v56, %v1152_v2  ;;  %v1204_v34 = vadd.f32 %v2534_v56, %v1156_v0  ;;  %v1205_v16 = vadd.f32 %v2534_v56, %v1160_v18 }
 0x617   :  { %v1214_v43 = vmul.f32 0.2, %v1198_v62  ;;  %v1215_v37 = vmul.f32 0.2, %v1199_v36  ;;  %v1216_v1 = vmul.f32 0.2, %v1200_v9  ;;  %v1206_v6 = vadd.f32 %v2534_v56, %v1164_v44 }
 0x618   :  { %v1217_v3 = vmul.f32 0.2, %v1201_v39  ;;  %v1218_v38 = vmul.f32 0.2, %v1202_v54  ;;  %v1219_v13 = vmul.f32 0.2, %v1203_v26  ;;  %v1207_v47 = vadd.f32 %v2534_v56, %v1168_v46 }
 0x619   :  { %v1230_v58 = vmax.f32 %v1198_v62, %v1214_v43  ;;  %v1231_v25 = vmax.f32 %v1199_v36, %v1215_v37  ;;  %v1232_v63 = vmax.f32 %v1200_v9, %v1216_v1  ;;  %v1220_v15 = vmul.f32 0.2, %v1204_v34 }
 0x61a   :  { %v1221_v49 = vmul.f32 0.2, %v1205_v16  ;;  %v1222_v31 = vmul.f32 0.2, %v1206_v6  ;;  %v1223_v53 = vmul.f32 0.2, %v1207_v47  ;;  %v1208_v24 = vadd.f32 %v2534_v56, %v1172_v45 }
 0x61b   :  { %v2540_v35 = vadd.f32 %v1230_v58, %v2218_v55  ;;  %v2545_v42 = vadd.f32 %v1231_v25, %v2221_v61  ;;  %v2550_v4 = vadd.f32 %v1232_v63, %v2228_v5  ;;  %v1233_v55 = vmax.f32 %v1201_v39, %v1217_v3 }
 0x61c   :  { %v1234_v61 = vmax.f32 %v1202_v54, %v1218_v38  ;;  %v1235_v5 = vmax.f32 %v1203_v26, %v1219_v13  ;;  %v1238_v52 = vmax.f32 %v1206_v6, %v1222_v31  ;;  %v1224_v0 = vmul.f32 0.2, %v1208_v24 }
 0x61d   :  { %1262 = vmax.xlane.f32.xlu0 %v2540_v35  ;;  %v2555_v10 = vadd.f32 %v1233_v55, %v2235_v14  ;;  %v1236_v14 = vmax.f32 %v1204_v34, %v1220_v15  ;;  %v1209_v44 = vadd.f32 %v2534_v56, %v1176_v21  ;;  %v1210_v45 = vadd.f32 %v2534_v56, %v2529_v32 }
 0x61e   :  { %v2560_v20 = vadd.f32 %v1234_v61, %v2242_v22  ;;  %v2565_v12 = vadd.f32 %v1235_v5, %v2253_v41  ;;  %v1237_v22 = vmax.f32 %v1205_v16, %v1221_v49  ;;  %v2580_v11 = vadd.f32 %v1238_v52, %v2275_v7 }
 0x61f   :  { %v2570_v8 = vadd.f32 %v1236_v14, %v2260_v28  ;;  %v1239_v28 = vmax.f32 %v1207_v47, %v1223_v53  ;;  %v1225_v23 = vmul.f32 0.2, %v1209_v44  ;;  %v1226_v36 = vmul.f32 0.2, %v1210_v45 }
 0x620   :  { %v2575_v41 = vadd.f32 %v1237_v22, %v2268_v59  ;;  %v1240_v59 = vmax.f32 %v1208_v24, %v1224_v0  ;;  %v1211_v43 = vadd.f32 %v2534_v56, %v1184_v57  ;;  %v1212_v32 = vadd.f32 %v2534_v56, %v2527_v51 }
 0x621   :  { %1264 = vmax.xlane.f32.xlu0 %v2545_v42  ;;  %v2585_v33 = vadd.f32 %v1239_v28, %v2286_v17  ;;  %v1241_v62 = vmax.f32 %v1209_v44, %v1225_v23  ;;  %v1242_v37 = vmax.f32 %v1210_v45, %v1226_v36  ;;  %v1213_v25 = vadd.f32 %v2534_v56, %v1192_v48 }
 0x622   :  { %v2591_v7 = vadd.f32 %v1240_v59, %v2293_v30  ;;  %v1227_v9 = vmul.f32 0.2, %v1211_v43  ;;  %v1228_v40 = vmul.f32 0.2, %v1212_v32 }
 0x623   :  { %v2596_v17 = vadd.f32 %v1241_v62, %v2301_v50  ;;  %v2602_v58 = vadd.f32 %v1242_v37, %v2308_v60  ;;  %v1229_v39 = vmul.f32 0.2, %v1213_v25 }
 0x624   :  { %v1243_v30 = vmax.f32 %v1211_v43, %v1227_v9  ;;  %v1244_v50 = vmax.f32 %v1212_v32, %v1228_v40 }
 0x625   :  { %1266 = vmax.xlane.f32.xlu0 %v2550_v4  ;;  %v1245_v63 = vmax.f32 %v1213_v25, %v1229_v39 }
 0x626   :  { %v2607_v1 = vadd.f32 %v1243_v30, %v2316_v29  ;;  %v2611_v51 = vadd.f32 %v1244_v50, %v2323_v19 }
 0x627   :  { %v2615_v60 = vadd.f32 %v1245_v63, %v2332_v27 }
 0x629   :  { %1268 = vmax.xlane.f32.xlu0 %v2555_v10 }
 0x62d   :  { %1270 = vmax.xlane.f32.xlu0 %v2560_v20 }
 0x631   :  { %1272 = vmax.xlane.f32.xlu0 %v2565_v12 }
 0x635   :  { %1274 = vmax.xlane.f32.xlu0 %v2570_v8 }
 0x639   :  { %1276 = vmax.xlane.f32.xlu0 %v2575_v41 }
 0x63d   :  { %1278 = vmax.xlane.f32.xlu0 %v2580_v11 }
 0x641   :  { %1280 = vmax.xlane.f32.xlu0 %v2585_v33 }
 0x645   :  { %1282 = vmax.xlane.f32.xlu0 %v2591_v7 }
 0x649   :  { %1284 = vmax.xlane.f32.xlu0 %v2596_v17 }
 0x64d   :  { %1286 = vmax.xlane.f32.xlu0 %v2602_v58 }
 0x651   :  { %1288 = vmax.xlane.f32.xlu0 %v2607_v1 }
 0x655   :  { %1290 = vmax.xlane.f32.xlu0 %v2611_v51 }
 0x659   :  { %1292 = vmax.xlane.f32.xlu0 %v2615_v60 }
 0x6aa   :  { %v1263_v56 = vpop.xlane.xlu0 %1262 }
 0x6ab   :  { %v1294_v3 = vsub.f32 %v2540_v35, %v1263_v56 }
 0x6ad   :  { %v1310_v29 = vmul.f32 1.442695, %v1294_v3 }
 0x6ae   :  { %v1265_v54 = vpop.xlane.xlu0 %1264 }
 0x6af   :  { %v1295_v2 = vsub.f32 %v2545_v42, %v1265_v54  ;;  %1959 = vpow2.f32 %v1310_v29 }
 0x6b1   :  { %v1312_v55 = vmul.f32 1.442695, %v1295_v2 }
 0x6b2   :  { %v1267_v38 = vpop.xlane.xlu0 %1266 }
 0x6b3   :  { %1961 = vpow2.f32 %v1312_v55  ;;  %v1296_v19 = vsub.f32 %v2550_v4, %v1267_v38 }
 0x6b5   :  { %v1314_v26 = vmul.f32 1.442695, %v1296_v19 }
 0x6b6   :  { %v1269_v61 = vpop.xlane.xlu0 %1268 }
 0x6b7   :  { %v1297_v27 = vsub.f32 %v2555_v10, %v1269_v61  ;;  %1963 = vpow2.f32 %v1314_v26 }
 0x6b9   :  { %v1316_v13 = vmul.f32 1.442695, %v1297_v27  ;;  %v1960_v18 = vpop.eup %1959 }
 0x6ba   :  { %v1271_v34 = vpop.xlane.xlu0 %1270 }
 0x6bb   :  { %1965 = vpow2.f32 %v1316_v13  ;;  %v1298_v35 = vsub.f32 %v2560_v20, %v1271_v34 }
 0x6bd   :  { %v1962_v5 = vpop.eup %1961  ;;  %v1318_v15 = vmul.f32 1.442695, %v1298_v35 }
 0x6be   :  { %v1273_v42 = vpop.xlane.xlu0 %1272  ;;  %v1366_v16 = vpack.c.bf16 %v1962_v5, %v1960_v18 }
 0x6bf   :  { %v1299_v14 = vsub.f32 %v2565_v12, %v1273_v42  ;;  %1967 = vpow2.f32 %v1318_v15 }
 0x6c0   :  { %1852 = vmatprep.mubr.bf16.mxu1 %v1366_v16 }
 0x6c1   :  { %v1320_v49 = vmul.f32 1.442695, %v1299_v14  ;;  %v1964_v6 = vpop.eup %1963 }
 0x6c2   :  { %v1275_v4 = vpop.xlane.xlu0 %1274 }
 0x6c3   :  { %1969 = vpow2.f32 %v1320_v49  ;;  %v1300_v10 = vsub.f32 %v2570_v8, %v1275_v4 }
 0x6c5   :  { %v1966_v46 = vpop.eup %1965  ;;  %v1322_v22 = vmul.f32 1.442695, %v1300_v10 }
 0x6c6   :  { %v1277_v31 = vpop.xlane.xlu0 %1276  ;;  %v1367_v47 = vpack.c.bf16 %v1966_v46, %v1964_v6 }
 0x6c7   :  { %v1301_v20 = vsub.f32 %v2575_v41, %v1277_v31  ;;  %1971 = vpow2.f32 %v1322_v22 }
 0x6c8   :  { %1853 = vmatmul.mubr.bf16.vlgmr.msra.gmra.mrb[16].mxu1 %v1367_v47 }
 0x6c9   :  { %v1324_v21 = vmul.f32 1.442695, %v1301_v20  ;;  %v1968_v53 = vpop.eup %1967 }
 0x6ca   :  { %v1279_v52 = vpop.xlane.xlu0 %1278 }
 0x6cb   :  { %1973 = vpow2.f32 %v1324_v21  ;;  %v1302_v12 = vsub.f32 %v2580_v11, %v1279_v52 }
 0x6cd   :  { %v1970_v24 = vpop.eup %1969  ;;  %v1326_v28 = vmul.f32 1.442695, %v1302_v12 }
 0x6ce   :  { %v1281_v0 = vpop.xlane.xlu0 %1280  ;;  %v1368_v44 = vpack.c.bf16 %v1970_v24, %v1968_v53 }
 0x6cf   :  { %v1303_v8 = vsub.f32 %v2585_v33, %v1281_v0  ;;  %1975 = vpow2.f32 %v1326_v28 }
 0x6d0   :  { %1856 = vmatprep.mubr.bf16.mxu1 %v1368_v44 }
 0x6d1   :  { %v1328_v48 = vmul.f32 1.442695, %v1303_v8  ;;  %v1972_v23 = vpop.eup %1971 }
 0x6d2   :  { %v1283_v59 = vpop.xlane.xlu0 %1282 }
 0x6d3   :  { %1977 = vpow2.f32 %v1328_v48  ;;  %v1304_v41 = vsub.f32 %v2591_v7, %v1283_v59 }
 0x6d5   :  { %v1974_v45 = vpop.eup %1973  ;;  %v1330_v57 = vmul.f32 1.442695, %v1304_v41  ;;  %v2685_v41 = vld [vmem:[%s2770_s3 + $0x1] ss:$0 sm:$0xff] }
 0x6d6   :  { %v1285_v62 = vpop.xlane.xlu0 %1284  ;;  %v1369_v36 = vpack.c.bf16 %v1974_v45, %v1972_v23 }
 0x6d7   :  { %v1305_v11 = vsub.f32 %v2596_v17, %v1285_v62  ;;  %1979 = vpow2.f32 %v1330_v57 }
 0x6d8   :  { %1857 = vmatmul.mubr.bf16.gmra.mrb[20].mxu1 %v1369_v36 }
 0x6d9   :  { %v1332_v43 = vmul.f32 1.442695, %v1305_v11  ;;  %v1976_v9 = vpop.eup %1975 }
 0x6da   :  { %v1287_v37 = vpop.xlane.xlu0 %1286 }
 0x6db   :  { %1981 = vpow2.f32 %v1332_v43  ;;  %v1306_v33 = vsub.f32 %v2602_v58, %v1287_v37 }
 0x6dd   :  { %v1978_v32 = vpop.eup %1977  ;;  %v1334_v30 = vmul.f32 1.442695, %v1306_v33 }
 0x6de   :  { %v1289_v40 = vpop.xlane.xlu0 %1288  ;;  %v1370_v25 = vpack.c.bf16 %v1978_v32, %v1976_v9 }
 0x6df   :  { %v1307_v7 = vsub.f32 %v2607_v1, %v1289_v40  ;;  %1983 = vpow2.f32 %v1334_v30 }
 0x6e0   :  { %1860 = vmatprep.mubr.bf16.mxu1 %v1370_v25 }
 0x6e1   :  { %v1336_v50 = vmul.f32 1.442695, %v1307_v7  ;;  %v1980_v63 = vpop.eup %1979 }
 0x6e2   :  { %v1291_v39 = vpop.xlane.xlu0 %1290 }
 0x6e3   :  { %1985 = vpow2.f32 %v1336_v50  ;;  %v1308_v17 = vsub.f32 %v2611_v51, %v1291_v39 }
 0x6e5   :  { %v1982_v56 = vpop.eup %1981  ;;  %v1338_v3 = vmul.f32 1.442695, %v1308_v17 }
 0x6e6   :  { %v1293_v29 = vpop.xlane.xlu0 %1292  ;;  %v1371_v54 = vpack.c.bf16 %v1982_v56, %v1980_v63 }
 0x6e7   :  { %v1309_v58 = vsub.f32 %v2615_v60, %v1293_v29  ;;  %1987 = vpow2.f32 %v1338_v3 }
 0x6e8   :  { %1861 = vmatmul.mubr.bf16.gmra.mrb[24].mxu1 %v1371_v54 }
 0x6e9   :  { %v1340_v2 = vmul.f32 1.442695, %v1309_v58  ;;  %v1984_v55 = vpop.eup %1983 }
 0x6eb   :  { %1989 = vpow2.f32 %v1340_v2 }
 0x6ed   :  { %v1986_v1 = vpop.eup %1985 }
 0x6ee   :  { %v1372_v38 = vpack.c.bf16 %v1986_v1, %v1984_v55 }
 0x6f0   :  { %1864 = vmatprep.mubr.bf16.mxu1 %v1372_v38 }
 0x6f1   :  { %v1988_v19 = vpop.eup %1987 }
 0x6f5   :  { %v1990_v26 = vpop.eup %1989 }
 0x6f6   :  { %v1373_v61 = vpack.c.bf16 %v1990_v26, %v1988_v19 }
 0x6f8   :  { %1865 = vmatmul.mubr.bf16.gmra.mrb[28].mxu1 %v1373_v61 }
 0x79b   :  { %v2634_v51 = vpop.f32.mrb[16].mxu1 }
 0x79c   :  { %1991 = vrcp.f32 %v2634_v51  ;;  %v2637_v27 = vpop.f32.mrb[17].mxu1 }
 0x79d   :  { %1993 = vrcp.f32 %v2637_v27  ;;  %v2640_v60 = vpop.f32.mrb[18].mxu1 }
 0x79e   :  { %v2642_v13 = vpop.f32.mrb[19].mxu1  ;;  %1995 = vrcp.f32 %v2640_v60 }
 0x79f   :  { %1997 = vrcp.f32 %v2642_v13 }
 0x7a6   :  { %v1992_v34 = vpop.eup %1991 }
 0x7a7   :  { %v1994_v35 = vpop.eup %1993  ;;  %1499 = vperm.xlu1 %1877, %v1992_v34  }
 0x7a8   :  { %1489 = vperm.xlu0 %1878, %v1994_v35   ;;  %v1996_v18 = vpop.eup %1995 }
 0x7a9   :  { %v1998_v16 = vpop.eup %1997 }
 0x7ab   :  { %1504 = vperm.xlu1 %1877, %v1996_v18   ;;  %v2646_v5 = vpop.f32.mrb[20].mxu1 }
 0x7ac   :  { %1999 = vrcp.f32 %v2646_v5  ;;  %v2649_v15 = vpop.f32.mrb[21].mxu1 }
 0x7ad   :  { %v2651_v42 = vpop.f32.mrb[22].mxu1 }
 0x7ae   :  { %2001 = vrcp.f32 %v2651_v42  ;;  %v2654_v14 = vpop.f32.mrb[23].mxu1 }
 0x7af   :  { %1494 = vperm.xlu1 %1877, %v1998_v16   ;;  %2003 = vrcp.f32 %v2649_v15 }
 0x7b0   :  { %2005 = vrcp.f32 %v2654_v14 }
 0x7b6   :  { %v2000_v49 = vpop.eup %1999 }
 0x7b7   :  { %1519 = vperm.xlu0 %1878, %v2000_v49  }
 0x7b8   :  { %v2002_v4 = vpop.eup %2001 }
 0x7b9   :  { %1524 = vperm.xlu1 %1877, %v2002_v4   ;;  %v2004_v10 = vpop.eup %2003 }
 0x7ba   :  { %v2006_v46 = vpop.eup %2005 }
 0x7bb   :  { %1509 = vperm.xlu0 %1878, %v2004_v10   ;;  %v2658_v6 = vpop.f32.mrb[24].mxu1 }
 0x7bc   :  { %2007 = vrcp.f32 %v2658_v6  ;;  %v2661_v22 = vpop.f32.mrb[25].mxu1 }
 0x7bd   :  { %1514 = vperm.xlu1 %1877, %v2006_v46   ;;  %v2663_v31 = vpop.f32.mrb[26].mxu1 }
 0x7be   :  { %2009 = vrcp.f32 %v2663_v31  ;;  %v2666_v47 = vpop.f32.mrb[27].mxu1 }
 0x7bf   :  { %2011 = vrcp.f32 %v2661_v22 }
 0x7c0   :  { %2013 = vrcp.f32 %v2666_v47 }
 0x7c6   :  { %v2008_v20 = vpop.eup %2007 }
 0x7c7   :  { %1539 = vperm.xlu0 %1878, %v2008_v20  }
 0x7c8   :  { %v2010_v21 = vpop.eup %2009 }
 0x7c9   :  { %1544 = vperm.xlu1 %1877, %v2010_v21   ;;  %v2012_v52 = vpop.eup %2011 }
 0x7ca   :  { %v2014_v53 = vpop.eup %2013 }
 0x7cb   :  { %1529 = vperm.xlu0 %1878, %v2012_v52   ;;  %v2670_v12 = vpop.f32.mrb[28].mxu1 }
 0x7cc   :  { %v2672_v24 = vpop.f32.mrb[29].mxu1 }
 0x7cd   :  { %2015 = vrcp.f32 %v2672_v24  ;;  %1534 = vperm.xlu1 %1877, %v2014_v53   ;;  %v2675_v28 = vpop.f32.mrb[30].mxu1 }
 0x7ce   :  { %v2677_v0 = vpop.f32.mrb[31].mxu1 }
 0x7cf   :  { %2017 = vrcp.f32 %v2677_v0 }
 0x7d0   :  { %2019 = vrcp.f32 %v2670_v12 }
 0x7d1   :  { %2021 = vrcp.f32 %v2675_v28 }
 0x7d7   :  { %v2016_v44 = vpop.eup %2015 }
 0x7d8   :  { %1549 = vperm.xlu0 %1878, %v2016_v44  }
 0x7d9   :  { %v2018_v8 = vpop.eup %2017 }
 0x7da   :  { %1554 = vperm.xlu1 %1877, %v2018_v8   ;;  %v2020_v48 = vpop.eup %2019 }
 0x7db   :  { %v2022_v59 = vpop.eup %2021 }
 0x7dc   :  { %1559 = vperm.xlu0 %1878, %v2020_v48  }
 0x7de   :  { %1564 = vperm.xlu1 %1877, %v2022_v59  }
 0x826   :  { %v1500_v23 = vpop.permute.xlu1 %1499 }
 0x827   :  { %v1569_v45 = vmul.f32 %v2634_v51, %v1500_v23  ;;  %v1490_v57 = vpop.permute.xlu0 %1489 }
 0x828   :  { %v1567_v62 = vmul.f32 %v1490_v57, %v2637_v27 }
 0x829   :  { %v1591_v36 = vadd.f32 %v2685_v41, %v1569_v45 }
 0x82a   :  { %v1589_v11 = vadd.f32 %v2685_v41, %v1567_v62  ;;  %v1505_v43 = vpop.permute.xlu1 %1504 }
 0x82b   :  { %1607 = vst [vmem:[%s2771_s4 + $0x10] sm:$0xff] %v1591_v36  ;;  %v1570_v37 = vmul.f32 %v2640_v60, %v1505_v43 }
 0x82c   :  { %1605 = vst [vmem:[%s2771_s4] sm:$0xff] %v1589_v11 }
 0x82d   :  { %v1592_v33 = vadd.f32 %v2685_v41, %v1570_v37 }
 0x82e   :  { %v1495_v9 = vpop.permute.xlu1 %1494 }
 0x82f   :  { %1608 = vst [vmem:[%s2771_s4 + $0x18] sm:$0xff] %v1592_v33  ;;  %v1568_v32 = vmul.f32 %v1495_v9, %v2642_v13 }
 0x831   :  { %v1590_v30 = vadd.f32 %v2685_v41, %v1568_v32 }
 0x833   :  { %1606 = vst [vmem:[%s2771_s4 + $0x8] sm:$0xff] %v1590_v30 }
 0x836   :  { %v1520_v40 = vpop.permute.xlu0 %1519 }
 0x837   :  { %v1573_v25 = vmul.f32 %v2646_v5, %v1520_v40 }
 0x838   :  { %v1525_v7 = vpop.permute.xlu1 %1524 }
 0x839   :  { %v1595_v50 = vadd.f32 %v2685_v41, %v1573_v25  ;;  %v1574_v39 = vmul.f32 %v2651_v42, %v1525_v7 }
 0x83a   :  { %v1510_v17 = vpop.permute.xlu0 %1509 }
 0x83b   :  { %1611 = vst [vmem:[%s2771_s4 + $0x30] sm:$0xff] %v1595_v50  ;;  %v1596_v63 = vadd.f32 %v2685_v41, %v1574_v39  ;;  %v1571_v56 = vmul.f32 %v1510_v17, %v2649_v15 }
 0x83c   :  { %v1515_v3 = vpop.permute.xlu1 %1514 }
 0x83d   :  { %1612 = vst [vmem:[%s2771_s4 + $0x38] sm:$0xff] %v1596_v63  ;;  %v1593_v29 = vadd.f32 %v2685_v41, %v1571_v56  ;;  %v1572_v54 = vmul.f32 %v1515_v3, %v2654_v14 }
 0x83f   :  { %1609 = vst [vmem:[%s2771_s4 + $0x20] sm:$0xff] %v1593_v29  ;;  %v1594_v58 = vadd.f32 %v2685_v41, %v1572_v54 }
 0x841   :  { %1610 = vst [vmem:[%s2771_s4 + $0x28] sm:$0xff] %v1594_v58 }
 0x846   :  { %v1540_v2 = vpop.permute.xlu0 %1539 }
 0x847   :  { %v1577_v55 = vmul.f32 %v2658_v6, %v1540_v2 }
 0x848   :  { %v1545_v1 = vpop.permute.xlu1 %1544 }
 0x849   :  { %v1599_v38 = vadd.f32 %v2685_v41, %v1577_v55  ;;  %v1578_v19 = vmul.f32 %v2663_v31, %v1545_v1 }
 0x84a   :  { %v1530_v26 = vpop.permute.xlu0 %1529 }
 0x84b   :  { %1615 = vst [vmem:[%s2771_s4 + $0x50] sm:$0xff] %v1599_v38  ;;  %v1600_v61 = vadd.f32 %v2685_v41, %v1578_v19  ;;  %v1575_v51 = vmul.f32 %v1530_v26, %v2661_v22 }
 0x84c   :  { %v1535_v27 = vpop.permute.xlu1 %1534 }
 0x84d   :  { %1616 = vst [vmem:[%s2771_s4 + $0x58] sm:$0xff] %v1600_v61  ;;  %v1597_v60 = vadd.f32 %v2685_v41, %v1575_v51  ;;  %v1576_v13 = vmul.f32 %v1535_v27, %v2666_v47 }
 0x84f   :  { %1613 = vst [vmem:[%s2771_s4 + $0x40] sm:$0xff] %v1597_v60  ;;  %v1598_v34 = vadd.f32 %v2685_v41, %v1576_v13 }
 0x851   :  { %1614 = vst [vmem:[%s2771_s4 + $0x48] sm:$0xff] %v1598_v34 }
 0x857   :  { %v1550_v35 = vpop.permute.xlu0 %1549 }
 0x858   :  { %v1579_v18 = vmul.f32 %v1550_v35, %v2672_v24 }
 0x859   :  { %v1555_v5 = vpop.permute.xlu1 %1554 }
 0x85a   :  { %v1601_v15 = vadd.f32 %v2685_v41, %v1579_v18  ;;  %v1580_v42 = vmul.f32 %v1555_v5, %v2677_v0 }
 0x85b   :  { %v1560_v16 = vpop.permute.xlu0 %1559 }
 0x85c   :  { %1617 = vst [vmem:[%s2771_s4 + $0x60] sm:$0xff] %v1601_v15  ;;  %v1602_v14 = vadd.f32 %v2685_v41, %v1580_v42  ;;  %v1581_v49 = vmul.f32 %v2670_v12, %v1560_v16 }
 0x85d   :  { %v1565_v4 = vpop.permute.xlu1 %1564 }
 0x85e   :  { %1618 = vst [vmem:[%s2771_s4 + $0x68] sm:$0xff] %v1602_v14  ;;  %v1603_v10 = vadd.f32 %v2685_v41, %v1581_v49  ;;  %v1582_v6 = vmul.f32 %v2675_v28, %v1565_v4 }
 0x860   :  { %1619 = vst [vmem:[%s2771_s4 + $0x70] sm:$0xff] %v1603_v10  ;;  %v1604_v46 = vadd.f32 %v2685_v41, %v1582_v6 }
 0x862   :  { %1620 = vst [vmem:[%s2771_s4 + $0x78] sm:$0xff] %v1604_v46 }

</bundles_post_ra>
